<compile_context>
chip_gen: v6e
topology: v6e:2x2x1
jax: 0.10.0
libtpu: 0.0.40
codegen_flags: <defaults>
</compile_context>

<pallas_src>
import functools

import jax
import jax.numpy as jnp
from jax.experimental import pallas as pl
from jax.experimental.pallas import tpu as pltpu  # noqa: F401  (kept for CompilerParams if scaled up)


# ----------------------------------------------------------------------------
# Fused Pallas kernel: n_layers Elman-RNN(tanh) layers (wavefront) + Linear + LogSoftmax
# ----------------------------------------------------------------------------
def _fused_bio_rnn_kernel(*refs, seq_len, batch, hidden_dim, n_layers):
    """refs = [x, (W_ih^T, W_hh^T, b)*n_layers, fcW^T, fcb,  out, hidden].

    x      : (B, S, input_size) f32, batch_first (as the PyTorch module gets it)
    weights: W_ih^T (in, H) bf16, W_hh^T (H, H) bf16, b = b_ih+b_hh (1, H) f32
    out    : (B*S, O) f32 log-probabilities, row b*S + t  (PyTorch view(-1, H) order)
    hidden : (n_layers, B, H) f32 final hidden state per layer
    """
    x_ref = refs[0]
    pos = 1
    wih_refs, whh_refs, b_refs = [], [], []
    for _ in range(n_layers):
        wih_refs.append(refs[pos])
        whh_refs.append(refs[pos + 1])
        b_refs.append(refs[pos + 2])
        pos += 3
    fc_wt_ref = refs[pos]
    fc_b_ref = refs[pos + 1]
    out_ref = refs[pos + 2]
    hidden_ref = refs[pos + 3]

    S, B, H = seq_len, batch, hidden_dim
    f32, bf16 = jnp.float32, jnp.bfloat16

    # Weights / biases resident in VMEM as values (loaded once).
    wih = [r[...] for r in wih_refs]          # (in_dim, H) bf16
    whh = [r[...] for r in whh_refs]          # (H, H)      bf16
    bias = [r[...] for r in b_refs]           # (1, H)      f32   (b_ih + b_hh)
    fc_wt = fc_wt_ref[...]                    # (H, O)      bf16
    fc_b = fc_b_ref[...]                      # (1, O)      f32

    # Hoisted layer-0 input projection (off the serial chain), per batch row:
    #   z0[b][t] = x[b, t] @ W_ih0^T + (b_ih0 + b_hh0)
    z0 = [
        jnp.dot(x_ref[b].astype(bf16), wih[0], preferred_element_type=f32) + bias[0]
        for b in range(B)
    ]                                          # each (S, H) f32

    # Per-(layer, batch) hidden states, (1, H) f32; init_hidden() == zeros.
    h = [[jnp.zeros((1, H), f32) for _ in range(B)] for _ in range(n_layers)]
    last_out = [[None] * S for _ in range(B)]  # last layer's per-step rows (for FC)

    # Wavefront: diagonal d = t + l.  At diagonal d, layer l handles time t = d - l,
    # consuming layer (l-1)'s time-t output produced at diagonal d-1 (read from the
    # *old* state `h`, written into `new_h`).  Per-diagonal layer steps are mutually
    # independent and pipeline through MXU/EUP; only S + n_layers - 1 serialized
    # matmul->tanh rounds remain on the critical path.
    for d in range(S + n_layers - 1):
        new_h = [list(row) for row in h]
        for l in range(n_layers):
            t = d - l
            if 0 <= t < S:
                for b in range(B):
                    rec = jnp.dot(h[l][b].astype(bf16), whh[l],
                                  preferred_element_type=f32)          # (1, H)
                    if l == 0:
                        pre = z0[b][t:t + 1, :] + rec                  # bias folded in z0
                    else:
                        pre = (jnp.dot(h[l - 1][b].astype(bf16), wih[l],
                                       preferred_element_type=f32)
                               + rec + bias[l])
                    hv = jnp.tanh(pre)                                 # f32 (1, H)
                    new_h[l][b] = hv
                    if l == n_layers - 1:
                        last_out[b][t] = hv
        h = new_h

    # Final hidden state per layer: (n_layers, B, H).
    for l in range(n_layers):
        hidden_ref[l] = jnp.concatenate(h[l], axis=0)                  # (B, H)

    # Epilogue (off the chain): per batch, FC + LogSoftmax, stored directly in
    # PyTorch's batch_first flatten order -> no wrapper-side reordering ops.
    for b in range(B):
        seq_b = jnp.concatenate(last_out[b], axis=0)                   # (S, H)
        y = jnp.dot(seq_b.astype(bf16), fc_wt,
                    preferred_element_type=f32) + fc_b                 # (S, O)
        m = jnp.max(y, axis=-1, keepdims=True)
        lse = jnp.log(jnp.sum(jnp.exp(y - m), axis=-1, keepdims=True)) + m
        out_ref[b * S:(b + 1) * S, :] = (y - lse).astype(out_ref.dtype)
    # TODO(synk): O=4 means the output store is a masked partial store; pad O to 128
    #             lane-dense only if output_size / S*B ever grow (negligible here).


# ----------------------------------------------------------------------------
# Forward wrapper (single pallas_call; everything resident in VMEM)
# ----------------------------------------------------------------------------
def model_bio_modified_forward(x, params):
    """
    x: (batch, seq, input_size)   [batch_first=True, like the PyTorch module]
    Returns (out, hidden):
      out:    (batch * seq, output_size)    log-probabilities
      hidden: (n_layers, batch, hidden_dim) final RNN hidden state
    """
    B, S, I = x.shape
    H = params["rnn"][0][0].shape[0]
    O = params["fc_w"].shape[0]
    n_layers = len(params["rnn"])

    # Weight transposes / casts below are constant-folded under jit (params are
    # closed-over constants) -> no per-call XLA dispatches besides the pallas_call.
    inputs = [x.astype(jnp.float32)]                                    # (B, S, I)
    for (w_ih, w_hh, b_ih, b_hh) in params["rnn"]:
        inputs.append(w_ih.T.astype(jnp.bfloat16))                      # (in, H)
        inputs.append(w_hh.T.astype(jnp.bfloat16))                      # (H, H)
        inputs.append((b_ih + b_hh).reshape(1, H).astype(jnp.float32))  # (1, H)
    inputs.append(params["fc_w"].T.astype(jnp.bfloat16))                # (H, O)
    inputs.append(params["fc_b"].reshape(1, O).astype(jnp.float32))     # (1, O)

    kernel = functools.partial(
        _fused_bio_rnn_kernel,
        seq_len=S, batch=B, hidden_dim=H, n_layers=n_layers,
    )

    out, hidden = pl.pallas_call(
        kernel,
        out_shape=(
            jax.ShapeDtypeStruct((B * S, O), jnp.float32),
            jax.ShapeDtypeStruct((n_layers, B, H), jnp.float32),
        ),
        # Grid-less single-TensorCore design: total data is a few KiB, so a grid would
        # only add per-step overhead.  At production sizes, add a batch-tiled grid with
        # dimension_semantics=("parallel", "arbitrary") and vmem_limit_bytes (v7x: 64 MiB).
    )(*inputs)
    return out, hidden


# ----------------------------------------------------------------------------
# Pure-JAX reference (for correctness check) and parameter init
# ----------------------------------------------------------------------------
def _reference_forward(x, params):
    B, S, _ = x.shape
    h_layers = []
    layer_in = x.astype(jnp.float32)                       # (B, S, in)
    for (w_ih, w_hh, b_ih, b_hh) in params["rnn"]:
        H = w_ih.shape[0]

        def step(h, x_t, w_ih=w_ih, w_hh=w_hh, b_ih=b_ih, b_hh=b_hh):
            h_new = jnp.tanh(x_t @ w_ih.T + h @ w_hh.T + b_ih + b_hh)
            return h_new, h_new

        x_time_major = jnp.transpose(layer_in, (1, 0, 2))   # (S, B, in)
        h_last, out_tm = jax.lax.scan(step, jnp.zeros((B, H), jnp.float32),
                                      x_time_major)
        h_layers.append(h_last)
        layer_in = jnp.transpose(out_tm, (1, 0, 2))         # (B, S, H)
    hidden = jnp.stack(h_layers, axis=0)
    flat = layer_in.reshape(B * S, -1)
    y = flat @ params["fc_w"].T + params["fc_b"]
    return jax.nn.log_softmax(y, axis=-1), hidden


def init_params(key, input_size, hidden_dim, n_layers, output_size):
    """Deterministic PyTorch-style uniform(-1/sqrt(H), 1/sqrt(H)) init."""
    k = 1.0 / jnp.sqrt(jnp.float32(hidden_dim))
    rnn = []
    for layer in range(n_layers):
        in_dim = input_size if layer == 0 else hidden_dim
        key, k1, k2, k3, k4 = jax.random.split(key, 5)
        rnn.append((
            jax.random.uniform(k1, (hidden_dim, in_dim), jnp.float32, -k, k),
            jax.random.uniform(k2, (hidden_dim, hidden_dim), jnp.float32, -k, k),
            jax.random.uniform(k3, (hidden_dim,), jnp.float32, -k, k),
            jax.random.uniform(k4, (hidden_dim,), jnp.float32, -k, k),
        ))
    key, k5, k6 = jax.random.split(key, 3)
    fc_w = jax.random.uniform(k5, (output_size, hidden_dim), jnp.float32, -k, k)
    fc_b = jax.random.uniform(k6, (output_size,), jnp.float32, -k, k)
    return {"rnn": rnn, "fc_w": fc_w, "fc_b": fc_b}


if __name__ == "__main__":
    batch, seq, input_size = 2, 8, 4
    hidden_dim, n_layers, output_size = 32, 2, 4

    key = jax.random.PRNGKey(0)
    key, kx = jax.random.split(key)
    x = jax.random.normal(kx, (batch, seq, input_size), jnp.float32)

    params = init_params(key, input_size, hidden_dim, n_layers, output_size)

    fwd = jax.jit(functools.partial(model_bio_modified_forward, params=params))
    out, hidden = fwd(x)
    jax.block_until_ready((out, hidden))

    assert out.shape == (batch * seq, output_size)
    assert hidden.shape == (n_layers, batch, hidden_dim)
    # rows of `out` are log-probabilities: exp-sum == 1 (normalization is exact in f32)
    assert jnp.allclose(jnp.sum(jnp.exp(out), axis=-1), 1.0, atol=1e-5)

    # Check against a pure-JAX f32 reference.  The kernel uses single-pass bf16 MXU
    # operands (per the perf review), so allow a few 1e-2 of absolute drift on the
    # O(1)-magnitude log-probs / tanh states.
    ref_out, ref_hidden = _reference_forward(x, params)
    assert jnp.allclose(out, ref_out, atol=3e-2, rtol=3e-2)
    assert jnp.allclose(hidden, ref_hidden, atol=3e-2, rtol=3e-2)

    print("KERNEL_OK")
</pallas_src>

<mosaic_0001>
module attributes {stable_mosaic.version = 11 : i64} {
  func.func @_fused_bio_rnn_kernel(%arg0: memref<2x8x4xf32, #tpu.memory_space<vmem>>, %arg1: memref<4x32xbf16, #tpu.memory_space<vmem>>, %arg2: memref<32x32xbf16, #tpu.memory_space<vmem>>, %arg3: memref<1x32xf32, #tpu.memory_space<vmem>>, %arg4: memref<32x32xbf16, #tpu.memory_space<vmem>>, %arg5: memref<32x32xbf16, #tpu.memory_space<vmem>>, %arg6: memref<1x32xf32, #tpu.memory_space<vmem>>, %arg7: memref<32x4xbf16, #tpu.memory_space<vmem>>, %arg8: memref<1x4xf32, #tpu.memory_space<vmem>>, %arg9: memref<16x4xf32, #tpu.memory_space<vmem>>, %arg10: memref<2x2x32xf32, #tpu.memory_space<vmem>>) attributes {dimension_semantics = [], scalar_prefetch = 0 : i64, scratch_operands = 0 : i64, tpu.core_type = #tpu.core_type<tc>} {
    %c0 = arith.constant 0 : index
    %c0_0 = arith.constant 0 : index
    %0 = vector.load %arg1[%c0, %c0_0] : memref<4x32xbf16, #tpu.memory_space<vmem>>, vector<4x32xbf16>
    %c0_1 = arith.constant 0 : index
    %c0_2 = arith.constant 0 : index
    %1 = vector.load %arg4[%c0_1, %c0_2] : memref<32x32xbf16, #tpu.memory_space<vmem>>, vector<32x32xbf16>
    %c0_3 = arith.constant 0 : index
    %c0_4 = arith.constant 0 : index
    %2 = vector.load %arg2[%c0_3, %c0_4] : memref<32x32xbf16, #tpu.memory_space<vmem>>, vector<32x32xbf16>
    %c0_5 = arith.constant 0 : index
    %c0_6 = arith.constant 0 : index
    %3 = vector.load %arg5[%c0_5, %c0_6] : memref<32x32xbf16, #tpu.memory_space<vmem>>, vector<32x32xbf16>
    %c0_7 = arith.constant 0 : index
    %c0_8 = arith.constant 0 : index
    %4 = vector.load %arg3[%c0_7, %c0_8] : memref<1x32xf32, #tpu.memory_space<vmem>>, vector<1x32xf32>
    %c0_9 = arith.constant 0 : index
    %c0_10 = arith.constant 0 : index
    %5 = vector.load %arg6[%c0_9, %c0_10] : memref<1x32xf32, #tpu.memory_space<vmem>>, vector<1x32xf32>
    %c0_11 = arith.constant 0 : index
    %c0_12 = arith.constant 0 : index
    %6 = vector.load %arg7[%c0_11, %c0_12] : memref<32x4xbf16, #tpu.memory_space<vmem>>, vector<32x4xbf16>
    %c0_13 = arith.constant 0 : index
    %c0_14 = arith.constant 0 : index
    %7 = vector.load %arg8[%c0_13, %c0_14] : memref<1x4xf32, #tpu.memory_space<vmem>>, vector<1x4xf32>
    %c0_15 = arith.constant 0 : index
    %c0_16 = arith.constant 0 : index
    %c0_17 = arith.constant 0 : index
    %8 = vector.load %arg0[%c0_15, %c0_16, %c0_17] : memref<2x8x4xf32, #tpu.memory_space<vmem>>, vector<1x8x4xf32>
    %9 = vector.shape_cast %8 : vector<1x8x4xf32> to vector<8x4xf32>
    %10 = arith.truncf %9 : vector<8x4xf32> to vector<8x4xbf16>
    %cst = arith.constant dense<0.000000e+00> : vector<8x32xf32>
    %11 = tpu.matmul %10, %0, %cst {dimension_numbers = #tpu.dot_dimension_numbers<[1], [0], [0], [1], [0, 0, 1, 1], [], []>} : vector<8x4xbf16>, vector<4x32xbf16>, vector<8x32xf32> -> vector<8x32xf32>
    %12 = vector.broadcast %4 : vector<1x32xf32> to vector<8x32xf32>
    %13 = arith.addf %11, %12 : vector<8x32xf32>
    %c1 = arith.constant 1 : index
    %c0_18 = arith.constant 0 : index
    %c0_19 = arith.constant 0 : index
    %14 = vector.load %arg0[%c1, %c0_18, %c0_19] : memref<2x8x4xf32, #tpu.memory_space<vmem>>, vector<1x8x4xf32>
    %15 = vector.shape_cast %14 : vector<1x8x4xf32> to vector<8x4xf32>
    %16 = arith.truncf %15 : vector<8x4xf32> to vector<8x4xbf16>
    %cst_20 = arith.constant dense<0.000000e+00> : vector<8x32xf32>
    %17 = tpu.matmul %16, %0, %cst_20 {dimension_numbers = #tpu.dot_dimension_numbers<[1], [0], [0], [1], [0, 0, 1, 1], [], []>} : vector<8x4xbf16>, vector<4x32xbf16>, vector<8x32xf32> -> vector<8x32xf32>
    %18 = vector.broadcast %4 : vector<1x32xf32> to vector<8x32xf32>
    %19 = arith.addf %17, %18 : vector<8x32xf32>
    %cst_21 = arith.constant 0.000000e+00 : f32
    %20 = vector.broadcast %cst_21 : f32 to vector<1x32xf32>
    %cst_22 = arith.constant 0.000000e+00 : f32
    %21 = vector.broadcast %cst_22 : f32 to vector<1x32xf32>
    %cst_23 = arith.constant 0.000000e+00 : f32
    %22 = vector.broadcast %cst_23 : f32 to vector<1x32xf32>
    %cst_24 = arith.constant 0.000000e+00 : f32
    %23 = vector.broadcast %cst_24 : f32 to vector<1x32xf32>
    %24 = arith.truncf %20 : vector<1x32xf32> to vector<1x32xbf16>
    %cst_25 = arith.constant dense<0.000000e+00> : vector<1x32xf32>
    %25 = tpu.matmul %24, %2, %cst_25 {dimension_numbers = #tpu.dot_dimension_numbers<[1], [0], [0], [1], [0, 0, 1, 1], [], []>} : vector<1x32xbf16>, vector<32x32xbf16>, vector<1x32xf32> -> vector<1x32xf32>
    %26 = vector.extract_strided_slice %13 {offsets = [0, 0], sizes = [1, 32], strides = [1, 1]} : vector<8x32xf32> to vector<1x32xf32>
    %27 = arith.addf %26, %25 : vector<1x32xf32>
    %28 = math.tanh %27 : vector<1x32xf32>
    %29 = arith.truncf %21 : vector<1x32xf32> to vector<1x32xbf16>
    %cst_26 = arith.constant dense<0.000000e+00> : vector<1x32xf32>
    %30 = tpu.matmul %29, %2, %cst_26 {dimension_numbers = #tpu.dot_dimension_numbers<[1], [0], [0], [1], [0, 0, 1, 1], [], []>} : vector<1x32xbf16>, vector<32x32xbf16>, vector<1x32xf32> -> vector<1x32xf32>
    %31 = vector.extract_strided_slice %19 {offsets = [0, 0], sizes = [1, 32], strides = [1, 1]} : vector<8x32xf32> to vector<1x32xf32>
    %32 = arith.addf %31, %30 : vector<1x32xf32>
    %33 = math.tanh %32 : vector<1x32xf32>
    %34 = arith.truncf %28 : vector<1x32xf32> to vector<1x32xbf16>
    %cst_27 = arith.constant dense<0.000000e+00> : vector<1x32xf32>
    %35 = tpu.matmul %34, %2, %cst_27 {dimension_numbers = #tpu.dot_dimension_numbers<[1], [0], [0], [1], [0, 0, 1, 1], [], []>} : vector<1x32xbf16>, vector<32x32xbf16>, vector<1x32xf32> -> vector<1x32xf32>
    %36 = vector.extract_strided_slice %13 {offsets = [1, 0], sizes = [1, 32], strides = [1, 1]} : vector<8x32xf32> to vector<1x32xf32>
    %37 = arith.addf %36, %35 : vector<1x32xf32>
    %38 = math.tanh %37 : vector<1x32xf32>
    %39 = arith.truncf %33 : vector<1x32xf32> to vector<1x32xbf16>
    %cst_28 = arith.constant dense<0.000000e+00> : vector<1x32xf32>
    %40 = tpu.matmul %39, %2, %cst_28 {dimension_numbers = #tpu.dot_dimension_numbers<[1], [0], [0], [1], [0, 0, 1, 1], [], []>} : vector<1x32xbf16>, vector<32x32xbf16>, vector<1x32xf32> -> vector<1x32xf32>
    %41 = vector.extract_strided_slice %19 {offsets = [1, 0], sizes = [1, 32], strides = [1, 1]} : vector<8x32xf32> to vector<1x32xf32>
    %42 = arith.addf %41, %40 : vector<1x32xf32>
    %43 = math.tanh %42 : vector<1x32xf32>
    %44 = arith.truncf %22 : vector<1x32xf32> to vector<1x32xbf16>
    %cst_29 = arith.constant dense<0.000000e+00> : vector<1x32xf32>
    %45 = tpu.matmul %44, %3, %cst_29 {dimension_numbers = #tpu.dot_dimension_numbers<[1], [0], [0], [1], [0, 0, 1, 1], [], []>} : vector<1x32xbf16>, vector<32x32xbf16>, vector<1x32xf32> -> vector<1x32xf32>
    %46 = arith.truncf %28 : vector<1x32xf32> to vector<1x32xbf16>
    %cst_30 = arith.constant dense<0.000000e+00> : vector<1x32xf32>
    %47 = tpu.matmul %46, %1, %cst_30 {dimension_numbers = #tpu.dot_dimension_numbers<[1], [0], [0], [1], [0, 0, 1, 1], [], []>} : vector<1x32xbf16>, vector<32x32xbf16>, vector<1x32xf32> -> vector<1x32xf32>
    %48 = arith.addf %47, %45 : vector<1x32xf32>
    %49 = arith.addf %48, %5 : vector<1x32xf32>
    %50 = math.tanh %49 : vector<1x32xf32>
    %51 = arith.truncf %23 : vector<1x32xf32> to vector<1x32xbf16>
    %cst_31 = arith.constant dense<0.000000e+00> : vector<1x32xf32>
    %52 = tpu.matmul %51, %3, %cst_31 {dimension_numbers = #tpu.dot_dimension_numbers<[1], [0], [0], [1], [0, 0, 1, 1], [], []>} : vector<1x32xbf16>, vector<32x32xbf16>, vector<1x32xf32> -> vector<1x32xf32>
    %53 = arith.truncf %33 : vector<1x32xf32> to vector<1x32xbf16>
    %cst_32 = arith.constant dense<0.000000e+00> : vector<1x32xf32>
    %54 = tpu.matmul %53, %1, %cst_32 {dimension_numbers = #tpu.dot_dimension_numbers<[1], [0], [0], [1], [0, 0, 1, 1], [], []>} : vector<1x32xbf16>, vector<32x32xbf16>, vector<1x32xf32> -> vector<1x32xf32>
    %55 = arith.addf %54, %52 : vector<1x32xf32>
    %56 = arith.addf %55, %5 : vector<1x32xf32>
    %57 = math.tanh %56 : vector<1x32xf32>
    %58 = arith.truncf %38 : vector<1x32xf32> to vector<1x32xbf16>
    %cst_33 = arith.constant dense<0.000000e+00> : vector<1x32xf32>
    %59 = tpu.matmul %58, %2, %cst_33 {dimension_numbers = #tpu.dot_dimension_numbers<[1], [0], [0], [1], [0, 0, 1, 1], [], []>} : vector<1x32xbf16>, vector<32x32xbf16>, vector<1x32xf32> -> vector<1x32xf32>
    %60 = vector.extract_strided_slice %13 {offsets = [2, 0], sizes = [1, 32], strides = [1, 1]} : vector<8x32xf32> to vector<1x32xf32>
    %61 = arith.addf %60, %59 : vector<1x32xf32>
    %62 = math.tanh %61 : vector<1x32xf32>
    %63 = arith.truncf %43 : vector<1x32xf32> to vector<1x32xbf16>
    %cst_34 = arith.constant dense<0.000000e+00> : vector<1x32xf32>
    %64 = tpu.matmul %63, %2, %cst_34 {dimension_numbers = #tpu.dot_dimension_numbers<[1], [0], [0], [1], [0, 0, 1, 1], [], []>} : vector<1x32xbf16>, vector<32x32xbf16>, vector<1x32xf32> -> vector<1x32xf32>
    %65 = vector.extract_strided_slice %19 {offsets = [2, 0], sizes = [1, 32], strides = [1, 1]} : vector<8x32xf32> to vector<1x32xf32>
    %66 = arith.addf %65, %64 : vector<1x32xf32>
    %67 = math.tanh %66 : vector<1x32xf32>
    %68 = arith.truncf %50 : vector<1x32xf32> to vector<1x32xbf16>
    %cst_35 = arith.constant dense<0.000000e+00> : vector<1x32xf32>
    %69 = tpu.matmul %68, %3, %cst_35 {dimension_numbers = #tpu.dot_dimension_numbers<[1], [0], [0], [1], [0, 0, 1, 1], [], []>} : vector<1x32xbf16>, vector<32x32xbf16>, vector<1x32xf32> -> vector<1x32xf32>
    %70 = arith.truncf %38 : vector<1x32xf32> to vector<1x32xbf16>
    %cst_36 = arith.constant dense<0.000000e+00> : vector<1x32xf32>
    %71 = tpu.matmul %70, %1, %cst_36 {dimension_numbers = #tpu.dot_dimension_numbers<[1], [0], [0], [1], [0, 0, 1, 1], [], []>} : vector<1x32xbf16>, vector<32x32xbf16>, vector<1x32xf32> -> vector<1x32xf32>
    %72 = arith.addf %71, %69 : vector<1x32xf32>
    %73 = arith.addf %72, %5 : vector<1x32xf32>
    %74 = math.tanh %73 : vector<1x32xf32>
    %75 = arith.truncf %57 : vector<1x32xf32> to vector<1x32xbf16>
    %cst_37 = arith.constant dense<0.000000e+00> : vector<1x32xf32>
    %76 = tpu.matmul %75, %3, %cst_37 {dimension_numbers = #tpu.dot_dimension_numbers<[1], [0], [0], [1], [0, 0, 1, 1], [], []>} : vector<1x32xbf16>, vector<32x32xbf16>, vector<1x32xf32> -> vector<1x32xf32>
    %77 = arith.truncf %43 : vector<1x32xf32> to vector<1x32xbf16>
    %cst_38 = arith.constant dense<0.000000e+00> : vector<1x32xf32>
    %78 = tpu.matmul %77, %1, %cst_38 {dimension_numbers = #tpu.dot_dimension_numbers<[1], [0], [0], [1], [0, 0, 1, 1], [], []>} : vector<1x32xbf16>, vector<32x32xbf16>, vector<1x32xf32> -> vector<1x32xf32>
    %79 = arith.addf %78, %76 : vector<1x32xf32>
    %80 = arith.addf %79, %5 : vector<1x32xf32>
    %81 = math.tanh %80 : vector<1x32xf32>
    %82 = arith.truncf %62 : vector<1x32xf32> to vector<1x32xbf16>
    %cst_39 = arith.constant dense<0.000000e+00> : vector<1x32xf32>
    %83 = tpu.matmul %82, %2, %cst_39 {dimension_numbers = #tpu.dot_dimension_numbers<[1], [0], [0], [1], [0, 0, 1, 1], [], []>} : vector<1x32xbf16>, vector<32x32xbf16>, vector<1x32xf32> -> vector<1x32xf32>
    %84 = vector.extract_strided_slice %13 {offsets = [3, 0], sizes = [1, 32], strides = [1, 1]} : vector<8x32xf32> to vector<1x32xf32>
    %85 = arith.addf %84, %83 : vector<1x32xf32>
    %86 = math.tanh %85 : vector<1x32xf32>
    %87 = arith.truncf %67 : vector<1x32xf32> to vector<1x32xbf16>
    %cst_40 = arith.constant dense<0.000000e+00> : vector<1x32xf32>
    %88 = tpu.matmul %87, %2, %cst_40 {dimension_numbers = #tpu.dot_dimension_numbers<[1], [0], [0], [1], [0, 0, 1, 1], [], []>} : vector<1x32xbf16>, vector<32x32xbf16>, vector<1x32xf32> -> vector<1x32xf32>
    %89 = vector.extract_strided_slice %19 {offsets = [3, 0], sizes = [1, 32], strides = [1, 1]} : vector<8x32xf32> to vector<1x32xf32>
    %90 = arith.addf %89, %88 : vector<1x32xf32>
    %91 = math.tanh %90 : vector<1x32xf32>
    %92 = arith.truncf %74 : vector<1x32xf32> to vector<1x32xbf16>
    %cst_41 = arith.constant dense<0.000000e+00> : vector<1x32xf32>
    %93 = tpu.matmul %92, %3, %cst_41 {dimension_numbers = #tpu.dot_dimension_numbers<[1], [0], [0], [1], [0, 0, 1, 1], [], []>} : vector<1x32xbf16>, vector<32x32xbf16>, vector<1x32xf32> -> vector<1x32xf32>
    %94 = arith.truncf %62 : vector<1x32xf32> to vector<1x32xbf16>
    %cst_42 = arith.constant dense<0.000000e+00> : vector<1x32xf32>
    %95 = tpu.matmul %94, %1, %cst_42 {dimension_numbers = #tpu.dot_dimension_numbers<[1], [0], [0], [1], [0, 0, 1, 1], [], []>} : vector<1x32xbf16>, vector<32x32xbf16>, vector<1x32xf32> -> vector<1x32xf32>
    %96 = arith.addf %95, %93 : vector<1x32xf32>
    %97 = arith.addf %96, %5 : vector<1x32xf32>
    %98 = math.tanh %97 : vector<1x32xf32>
    %99 = arith.truncf %81 : vector<1x32xf32> to vector<1x32xbf16>
    %cst_43 = arith.constant dense<0.000000e+00> : vector<1x32xf32>
    %100 = tpu.matmul %99, %3, %cst_43 {dimension_numbers = #tpu.dot_dimension_numbers<[1], [0], [0], [1], [0, 0, 1, 1], [], []>} : vector<1x32xbf16>, vector<32x32xbf16>, vector<1x32xf32> -> vector<1x32xf32>
    %101 = arith.truncf %67 : vector<1x32xf32> to vector<1x32xbf16>
    %cst_44 = arith.constant dense<0.000000e+00> : vector<1x32xf32>
    %102 = tpu.matmul %101, %1, %cst_44 {dimension_numbers = #tpu.dot_dimension_numbers<[1], [0], [0], [1], [0, 0, 1, 1], [], []>} : vector<1x32xbf16>, vector<32x32xbf16>, vector<1x32xf32> -> vector<1x32xf32>
    %103 = arith.addf %102, %100 : vector<1x32xf32>
    %104 = arith.addf %103, %5 : vector<1x32xf32>
    %105 = math.tanh %104 : vector<1x32xf32>
    %106 = arith.truncf %86 : vector<1x32xf32> to vector<1x32xbf16>
    %cst_45 = arith.constant dense<0.000000e+00> : vector<1x32xf32>
    %107 = tpu.matmul %106, %2, %cst_45 {dimension_numbers = #tpu.dot_dimension_numbers<[1], [0], [0], [1], [0, 0, 1, 1], [], []>} : vector<1x32xbf16>, vector<32x32xbf16>, vector<1x32xf32> -> vector<1x32xf32>
    %108 = vector.extract_strided_slice %13 {offsets = [4, 0], sizes = [1, 32], strides = [1, 1]} : vector<8x32xf32> to vector<1x32xf32>
    %109 = arith.addf %108, %107 : vector<1x32xf32>
    %110 = math.tanh %109 : vector<1x32xf32>
    %111 = arith.truncf %91 : vector<1x32xf32> to vector<1x32xbf16>
    %cst_46 = arith.constant dense<0.000000e+00> : vector<1x32xf32>
    %112 = tpu.matmul %111, %2, %cst_46 {dimension_numbers = #tpu.dot_dimension_numbers<[1], [0], [0], [1], [0, 0, 1, 1], [], []>} : vector<1x32xbf16>, vector<32x32xbf16>, vector<1x32xf32> -> vector<1x32xf32>
    %113 = vector.extract_strided_slice %19 {offsets = [4, 0], sizes = [1, 32], strides = [1, 1]} : vector<8x32xf32> to vector<1x32xf32>
    %114 = arith.addf %113, %112 : vector<1x32xf32>
    %115 = math.tanh %114 : vector<1x32xf32>
    %116 = arith.truncf %98 : vector<1x32xf32> to vector<1x32xbf16>
    %cst_47 = arith.constant dense<0.000000e+00> : vector<1x32xf32>
    %117 = tpu.matmul %116, %3, %cst_47 {dimension_numbers = #tpu.dot_dimension_numbers<[1], [0], [0], [1], [0, 0, 1, 1], [], []>} : vector<1x32xbf16>, vector<32x32xbf16>, vector<1x32xf32> -> vector<1x32xf32>
    %118 = arith.truncf %86 : vector<1x32xf32> to vector<1x32xbf16>
    %cst_48 = arith.constant dense<0.000000e+00> : vector<1x32xf32>
    %119 = tpu.matmul %118, %1, %cst_48 {dimension_numbers = #tpu.dot_dimension_numbers<[1], [0], [0], [1], [0, 0, 1, 1], [], []>} : vector<1x32xbf16>, vector<32x32xbf16>, vector<1x32xf32> -> vector<1x32xf32>
    %120 = arith.addf %119, %117 : vector<1x32xf32>
    %121 = arith.addf %120, %5 : vector<1x32xf32>
    %122 = math.tanh %121 : vector<1x32xf32>
    %123 = arith.truncf %105 : vector<1x32xf32> to vector<1x32xbf16>
    %cst_49 = arith.constant dense<0.000000e+00> : vector<1x32xf32>
    %124 = tpu.matmul %123, %3, %cst_49 {dimension_numbers = #tpu.dot_dimension_numbers<[1], [0], [0], [1], [0, 0, 1, 1], [], []>} : vector<1x32xbf16>, vector<32x32xbf16>, vector<1x32xf32> -> vector<1x32xf32>
    %125 = arith.truncf %91 : vector<1x32xf32> to vector<1x32xbf16>
    %cst_50 = arith.constant dense<0.000000e+00> : vector<1x32xf32>
    %126 = tpu.matmul %125, %1, %cst_50 {dimension_numbers = #tpu.dot_dimension_numbers<[1], [0], [0], [1], [0, 0, 1, 1], [], []>} : vector<1x32xbf16>, vector<32x32xbf16>, vector<1x32xf32> -> vector<1x32xf32>
    %127 = arith.addf %126, %124 : vector<1x32xf32>
    %128 = arith.addf %127, %5 : vector<1x32xf32>
    %129 = math.tanh %128 : vector<1x32xf32>
    %130 = arith.truncf %110 : vector<1x32xf32> to vector<1x32xbf16>
    %cst_51 = arith.constant dense<0.000000e+00> : vector<1x32xf32>
    %131 = tpu.matmul %130, %2, %cst_51 {dimension_numbers = #tpu.dot_dimension_numbers<[1], [0], [0], [1], [0, 0, 1, 1], [], []>} : vector<1x32xbf16>, vector<32x32xbf16>, vector<1x32xf32> -> vector<1x32xf32>
    %132 = vector.extract_strided_slice %13 {offsets = [5, 0], sizes = [1, 32], strides = [1, 1]} : vector<8x32xf32> to vector<1x32xf32>
    %133 = arith.addf %132, %131 : vector<1x32xf32>
    %134 = math.tanh %133 : vector<1x32xf32>
    %135 = arith.truncf %115 : vector<1x32xf32> to vector<1x32xbf16>
    %cst_52 = arith.constant dense<0.000000e+00> : vector<1x32xf32>
    %136 = tpu.matmul %135, %2, %cst_52 {dimension_numbers = #tpu.dot_dimension_numbers<[1], [0], [0], [1], [0, 0, 1, 1], [], []>} : vector<1x32xbf16>, vector<32x32xbf16>, vector<1x32xf32> -> vector<1x32xf32>
    %137 = vector.extract_strided_slice %19 {offsets = [5, 0], sizes = [1, 32], strides = [1, 1]} : vector<8x32xf32> to vector<1x32xf32>
    %138 = arith.addf %137, %136 : vector<1x32xf32>
    %139 = math.tanh %138 : vector<1x32xf32>
    %140 = arith.truncf %122 : vector<1x32xf32> to vector<1x32xbf16>
    %cst_53 = arith.constant dense<0.000000e+00> : vector<1x32xf32>
    %141 = tpu.matmul %140, %3, %cst_53 {dimension_numbers = #tpu.dot_dimension_numbers<[1], [0], [0], [1], [0, 0, 1, 1], [], []>} : vector<1x32xbf16>, vector<32x32xbf16>, vector<1x32xf32> -> vector<1x32xf32>
    %142 = arith.truncf %110 : vector<1x32xf32> to vector<1x32xbf16>
    %cst_54 = arith.constant dense<0.000000e+00> : vector<1x32xf32>
    %143 = tpu.matmul %142, %1, %cst_54 {dimension_numbers = #tpu.dot_dimension_numbers<[1], [0], [0], [1], [0, 0, 1, 1], [], []>} : vector<1x32xbf16>, vector<32x32xbf16>, vector<1x32xf32> -> vector<1x32xf32>
    %144 = arith.addf %143, %141 : vector<1x32xf32>
    %145 = arith.addf %144, %5 : vector<1x32xf32>
    %146 = math.tanh %145 : vector<1x32xf32>
    %147 = arith.truncf %129 : vector<1x32xf32> to vector<1x32xbf16>
    %cst_55 = arith.constant dense<0.000000e+00> : vector<1x32xf32>
    %148 = tpu.matmul %147, %3, %cst_55 {dimension_numbers = #tpu.dot_dimension_numbers<[1], [0], [0], [1], [0, 0, 1, 1], [], []>} : vector<1x32xbf16>, vector<32x32xbf16>, vector<1x32xf32> -> vector<1x32xf32>
    %149 = arith.truncf %115 : vector<1x32xf32> to vector<1x32xbf16>
    %cst_56 = arith.constant dense<0.000000e+00> : vector<1x32xf32>
    %150 = tpu.matmul %149, %1, %cst_56 {dimension_numbers = #tpu.dot_dimension_numbers<[1], [0], [0], [1], [0, 0, 1, 1], [], []>} : vector<1x32xbf16>, vector<32x32xbf16>, vector<1x32xf32> -> vector<1x32xf32>
    %151 = arith.addf %150, %148 : vector<1x32xf32>
    %152 = arith.addf %151, %5 : vector<1x32xf32>
    %153 = math.tanh %152 : vector<1x32xf32>
    %154 = arith.truncf %134 : vector<1x32xf32> to vector<1x32xbf16>
    %cst_57 = arith.constant dense<0.000000e+00> : vector<1x32xf32>
    %155 = tpu.matmul %154, %2, %cst_57 {dimension_numbers = #tpu.dot_dimension_numbers<[1], [0], [0], [1], [0, 0, 1, 1], [], []>} : vector<1x32xbf16>, vector<32x32xbf16>, vector<1x32xf32> -> vector<1x32xf32>
    %156 = vector.extract_strided_slice %13 {offsets = [6, 0], sizes = [1, 32], strides = [1, 1]} : vector<8x32xf32> to vector<1x32xf32>
    %157 = arith.addf %156, %155 : vector<1x32xf32>
    %158 = math.tanh %157 : vector<1x32xf32>
    %159 = arith.truncf %139 : vector<1x32xf32> to vector<1x32xbf16>
    %cst_58 = arith.constant dense<0.000000e+00> : vector<1x32xf32>
    %160 = tpu.matmul %159, %2, %cst_58 {dimension_numbers = #tpu.dot_dimension_numbers<[1], [0], [0], [1], [0, 0, 1, 1], [], []>} : vector<1x32xbf16>, vector<32x32xbf16>, vector<1x32xf32> -> vector<1x32xf32>
    %161 = vector.extract_strided_slice %19 {offsets = [6, 0], sizes = [1, 32], strides = [1, 1]} : vector<8x32xf32> to vector<1x32xf32>
    %162 = arith.addf %161, %160 : vector<1x32xf32>
    %163 = math.tanh %162 : vector<1x32xf32>
    %164 = arith.truncf %146 : vector<1x32xf32> to vector<1x32xbf16>
    %cst_59 = arith.constant dense<0.000000e+00> : vector<1x32xf32>
    %165 = tpu.matmul %164, %3, %cst_59 {dimension_numbers = #tpu.dot_dimension_numbers<[1], [0], [0], [1], [0, 0, 1, 1], [], []>} : vector<1x32xbf16>, vector<32x32xbf16>, vector<1x32xf32> -> vector<1x32xf32>
    %166 = arith.truncf %134 : vector<1x32xf32> to vector<1x32xbf16>
    %cst_60 = arith.constant dense<0.000000e+00> : vector<1x32xf32>
    %167 = tpu.matmul %166, %1, %cst_60 {dimension_numbers = #tpu.dot_dimension_numbers<[1], [0], [0], [1], [0, 0, 1, 1], [], []>} : vector<1x32xbf16>, vector<32x32xbf16>, vector<1x32xf32> -> vector<1x32xf32>
    %168 = arith.addf %167, %165 : vector<1x32xf32>
    %169 = arith.addf %168, %5 : vector<1x32xf32>
    %170 = math.tanh %169 : vector<1x32xf32>
    %171 = arith.truncf %153 : vector<1x32xf32> to vector<1x32xbf16>
    %cst_61 = arith.constant dense<0.000000e+00> : vector<1x32xf32>
    %172 = tpu.matmul %171, %3, %cst_61 {dimension_numbers = #tpu.dot_dimension_numbers<[1], [0], [0], [1], [0, 0, 1, 1], [], []>} : vector<1x32xbf16>, vector<32x32xbf16>, vector<1x32xf32> -> vector<1x32xf32>
    %173 = arith.truncf %139 : vector<1x32xf32> to vector<1x32xbf16>
    %cst_62 = arith.constant dense<0.000000e+00> : vector<1x32xf32>
    %174 = tpu.matmul %173, %1, %cst_62 {dimension_numbers = #tpu.dot_dimension_numbers<[1], [0], [0], [1], [0, 0, 1, 1], [], []>} : vector<1x32xbf16>, vector<32x32xbf16>, vector<1x32xf32> -> vector<1x32xf32>
    %175 = arith.addf %174, %172 : vector<1x32xf32>
    %176 = arith.addf %175, %5 : vector<1x32xf32>
    %177 = math.tanh %176 : vector<1x32xf32>
    %178 = arith.truncf %158 : vector<1x32xf32> to vector<1x32xbf16>
    %cst_63 = arith.constant dense<0.000000e+00> : vector<1x32xf32>
    %179 = tpu.matmul %178, %2, %cst_63 {dimension_numbers = #tpu.dot_dimension_numbers<[1], [0], [0], [1], [0, 0, 1, 1], [], []>} : vector<1x32xbf16>, vector<32x32xbf16>, vector<1x32xf32> -> vector<1x32xf32>
    %180 = vector.extract_strided_slice %13 {offsets = [7, 0], sizes = [1, 32], strides = [1, 1]} : vector<8x32xf32> to vector<1x32xf32>
    %181 = arith.addf %180, %179 : vector<1x32xf32>
    %182 = math.tanh %181 : vector<1x32xf32>
    %183 = arith.truncf %163 : vector<1x32xf32> to vector<1x32xbf16>
    %cst_64 = arith.constant dense<0.000000e+00> : vector<1x32xf32>
    %184 = tpu.matmul %183, %2, %cst_64 {dimension_numbers = #tpu.dot_dimension_numbers<[1], [0], [0], [1], [0, 0, 1, 1], [], []>} : vector<1x32xbf16>, vector<32x32xbf16>, vector<1x32xf32> -> vector<1x32xf32>
    %185 = vector.extract_strided_slice %19 {offsets = [7, 0], sizes = [1, 32], strides = [1, 1]} : vector<8x32xf32> to vector<1x32xf32>
    %186 = arith.addf %185, %184 : vector<1x32xf32>
    %187 = math.tanh %186 : vector<1x32xf32>
    %188 = arith.truncf %170 : vector<1x32xf32> to vector<1x32xbf16>
    %cst_65 = arith.constant dense<0.000000e+00> : vector<1x32xf32>
    %189 = tpu.matmul %188, %3, %cst_65 {dimension_numbers = #tpu.dot_dimension_numbers<[1], [0], [0], [1], [0, 0, 1, 1], [], []>} : vector<1x32xbf16>, vector<32x32xbf16>, vector<1x32xf32> -> vector<1x32xf32>
    %190 = arith.truncf %158 : vector<1x32xf32> to vector<1x32xbf16>
    %cst_66 = arith.constant dense<0.000000e+00> : vector<1x32xf32>
    %191 = tpu.matmul %190, %1, %cst_66 {dimension_numbers = #tpu.dot_dimension_numbers<[1], [0], [0], [1], [0, 0, 1, 1], [], []>} : vector<1x32xbf16>, vector<32x32xbf16>, vector<1x32xf32> -> vector<1x32xf32>
    %192 = arith.addf %191, %189 : vector<1x32xf32>
    %193 = arith.addf %192, %5 : vector<1x32xf32>
    %194 = math.tanh %193 : vector<1x32xf32>
    %195 = arith.truncf %177 : vector<1x32xf32> to vector<1x32xbf16>
    %cst_67 = arith.constant dense<0.000000e+00> : vector<1x32xf32>
    %196 = tpu.matmul %195, %3, %cst_67 {dimension_numbers = #tpu.dot_dimension_numbers<[1], [0], [0], [1], [0, 0, 1, 1], [], []>} : vector<1x32xbf16>, vector<32x32xbf16>, vector<1x32xf32> -> vector<1x32xf32>
    %197 = arith.truncf %163 : vector<1x32xf32> to vector<1x32xbf16>
    %cst_68 = arith.constant dense<0.000000e+00> : vector<1x32xf32>
    %198 = tpu.matmul %197, %1, %cst_68 {dimension_numbers = #tpu.dot_dimension_numbers<[1], [0], [0], [1], [0, 0, 1, 1], [], []>} : vector<1x32xbf16>, vector<32x32xbf16>, vector<1x32xf32> -> vector<1x32xf32>
    %199 = arith.addf %198, %196 : vector<1x32xf32>
    %200 = arith.addf %199, %5 : vector<1x32xf32>
    %201 = math.tanh %200 : vector<1x32xf32>
    %202 = arith.truncf %194 : vector<1x32xf32> to vector<1x32xbf16>
    %cst_69 = arith.constant dense<0.000000e+00> : vector<1x32xf32>
    %203 = tpu.matmul %202, %3, %cst_69 {dimension_numbers = #tpu.dot_dimension_numbers<[1], [0], [0], [1], [0, 0, 1, 1], [], []>} : vector<1x32xbf16>, vector<32x32xbf16>, vector<1x32xf32> -> vector<1x32xf32>
    %204 = arith.truncf %182 : vector<1x32xf32> to vector<1x32xbf16>
    %cst_70 = arith.constant dense<0.000000e+00> : vector<1x32xf32>
    %205 = tpu.matmul %204, %1, %cst_70 {dimension_numbers = #tpu.dot_dimension_numbers<[1], [0], [0], [1], [0, 0, 1, 1], [], []>} : vector<1x32xbf16>, vector<32x32xbf16>, vector<1x32xf32> -> vector<1x32xf32>
    %206 = arith.addf %205, %203 : vector<1x32xf32>
    %207 = arith.addf %206, %5 : vector<1x32xf32>
    %208 = math.tanh %207 : vector<1x32xf32>
    %209 = arith.truncf %201 : vector<1x32xf32> to vector<1x32xbf16>
    %cst_71 = arith.constant dense<0.000000e+00> : vector<1x32xf32>
    %210 = tpu.matmul %209, %3, %cst_71 {dimension_numbers = #tpu.dot_dimension_numbers<[1], [0], [0], [1], [0, 0, 1, 1], [], []>} : vector<1x32xbf16>, vector<32x32xbf16>, vector<1x32xf32> -> vector<1x32xf32>
    %211 = arith.truncf %187 : vector<1x32xf32> to vector<1x32xbf16>
    %cst_72 = arith.constant dense<0.000000e+00> : vector<1x32xf32>
    %212 = tpu.matmul %211, %1, %cst_72 {dimension_numbers = #tpu.dot_dimension_numbers<[1], [0], [0], [1], [0, 0, 1, 1], [], []>} : vector<1x32xbf16>, vector<32x32xbf16>, vector<1x32xf32> -> vector<1x32xf32>
    %213 = arith.addf %212, %210 : vector<1x32xf32>
    %214 = arith.addf %213, %5 : vector<1x32xf32>
    %215 = math.tanh %214 : vector<1x32xf32>
    %216 = tpu.concatenate %182, %187 in 0 : vector<1x32xf32>, vector<1x32xf32> -> vector<2x32xf32>
    %c0_73 = arith.constant 0 : index
    %c0_74 = arith.constant 0 : index
    %c0_75 = arith.constant 0 : index
    %217 = vector.load %arg10[%c0_73, %c0_74, %c0_75] : memref<2x2x32xf32, #tpu.memory_space<vmem>>, vector<1x2x32xf32>
    %218 = vector.shape_cast %217 : vector<1x2x32xf32> to vector<2x32xf32>
    %219 = vector.shape_cast %216 : vector<2x32xf32> to vector<1x2x32xf32>
    tpu.vector_store %arg10[%c0_73, %c0_74, %c0_75], %219 {strides = array<i32>} : memref<2x2x32xf32, #tpu.memory_space<vmem>>, vector<1x2x32xf32>,
    %220 = tpu.concatenate %208, %215 in 0 : vector<1x32xf32>, vector<1x32xf32> -> vector<2x32xf32>
    %c1_76 = arith.constant 1 : index
    %c0_77 = arith.constant 0 : index
    %c0_78 = arith.constant 0 : index
    %221 = vector.load %arg10[%c1_76, %c0_77, %c0_78] : memref<2x2x32xf32, #tpu.memory_space<vmem>>, vector<1x2x32xf32>
    %222 = vector.shape_cast %221 : vector<1x2x32xf32> to vector<2x32xf32>
    %223 = vector.shape_cast %220 : vector<2x32xf32> to vector<1x2x32xf32>
    tpu.vector_store %arg10[%c1_76, %c0_77, %c0_78], %223 {strides = array<i32>} : memref<2x2x32xf32, #tpu.memory_space<vmem>>, vector<1x2x32xf32>,
    %224 = tpu.concatenate %50, %74, %98, %122, %146, %170, %194, %208 in 0 : vector<1x32xf32>, vector<1x32xf32>, vector<1x32xf32>, vector<1x32xf32>, vector<1x32xf32>, vector<1x32xf32>, vector<1x32xf32>, vector<1x32xf32> -> vector<8x32xf32>
    %225 = arith.truncf %224 : vector<8x32xf32> to vector<8x32xbf16>
    %cst_79 = arith.constant dense<0.000000e+00> : vector<8x4xf32>
    %226 = tpu.matmul %225, %6, %cst_79 {dimension_numbers = #tpu.dot_dimension_numbers<[1], [0], [0], [1], [0, 0, 1, 1], [], []>} : vector<8x32xbf16>, vector<32x4xbf16>, vector<8x4xf32> -> vector<8x4xf32>
    %227 = vector.broadcast %7 : vector<1x4xf32> to vector<8x4xf32>
    %228 = arith.addf %226, %227 : vector<8x4xf32>
    %cst_80 = arith.constant dense<0xFF800000> : vector<8xf32>
    %229 = vector.multi_reduction <maximumf>, %228, %cst_80 [1] : vector<8x4xf32> to vector<8xf32>
    %230 = vector.shape_cast %229 : vector<8xf32> to vector<8x1xf32>
    %231 = vector.broadcast %230 : vector<8x1xf32> to vector<8x4xf32>
    %232 = arith.subf %228, %231 : vector<8x4xf32>
    %233 = math.exp %232 : vector<8x4xf32>
    %cst_81 = arith.constant dense<0.000000e+00> : vector<8xf32>
    %234 = vector.multi_reduction <add>, %233, %cst_81 [1] : vector<8x4xf32> to vector<8xf32>
    %235 = vector.shape_cast %234 : vector<8xf32> to vector<8x1xf32>
    %236 = math.log %235 : vector<8x1xf32>
    %237 = arith.addf %236, %230 : vector<8x1xf32>
    %238 = vector.broadcast %237 : vector<8x1xf32> to vector<8x4xf32>
    %239 = arith.subf %228, %238 : vector<8x4xf32>
    %c0_82 = arith.constant 0 : index
    %c0_83 = arith.constant 0 : index
    %240 = vector.load %arg9[%c0_82, %c0_83] : memref<16x4xf32, #tpu.memory_space<vmem>>, vector<8x4xf32>
    tpu.vector_store %arg9[%c0_82, %c0_83], %239 {strides = array<i32>} : memref<16x4xf32, #tpu.memory_space<vmem>>, vector<8x4xf32>,
    %241 = tpu.concatenate %57, %81, %105, %129, %153, %177, %201, %215 in 0 : vector<1x32xf32>, vector<1x32xf32>, vector<1x32xf32>, vector<1x32xf32>, vector<1x32xf32>, vector<1x32xf32>, vector<1x32xf32>, vector<1x32xf32> -> vector<8x32xf32>
    %242 = arith.truncf %241 : vector<8x32xf32> to vector<8x32xbf16>
    %cst_84 = arith.constant dense<0.000000e+00> : vector<8x4xf32>
    %243 = tpu.matmul %242, %6, %cst_84 {dimension_numbers = #tpu.dot_dimension_numbers<[1], [0], [0], [1], [0, 0, 1, 1], [], []>} : vector<8x32xbf16>, vector<32x4xbf16>, vector<8x4xf32> -> vector<8x4xf32>
    %244 = vector.broadcast %7 : vector<1x4xf32> to vector<8x4xf32>
    %245 = arith.addf %243, %244 : vector<8x4xf32>
    %cst_85 = arith.constant dense<0xFF800000> : vector<8xf32>
    %246 = vector.multi_reduction <maximumf>, %245, %cst_85 [1] : vector<8x4xf32> to vector<8xf32>
    %247 = vector.shape_cast %246 : vector<8xf32> to vector<8x1xf32>
    %248 = vector.broadcast %247 : vector<8x1xf32> to vector<8x4xf32>
    %249 = arith.subf %245, %248 : vector<8x4xf32>
    %250 = math.exp %249 : vector<8x4xf32>
    %cst_86 = arith.constant dense<0.000000e+00> : vector<8xf32>
    %251 = vector.multi_reduction <add>, %250, %cst_86 [1] : vector<8x4xf32> to vector<8xf32>
    %252 = vector.shape_cast %251 : vector<8xf32> to vector<8x1xf32>
    %253 = math.log %252 : vector<8x1xf32>
    %254 = arith.addf %253, %247 : vector<8x1xf32>
    %255 = vector.broadcast %254 : vector<8x1xf32> to vector<8x4xf32>
    %256 = arith.subf %245, %255 : vector<8x4xf32>
    %c8 = arith.constant 8 : index
    %c0_87 = arith.constant 0 : index
    %257 = vector.load %arg9[%c8, %c0_87] : memref<16x4xf32, #tpu.memory_space<vmem>>, vector<8x4xf32>
    tpu.vector_store %arg9[%c8, %c0_87], %256 {strides = array<i32>} : memref<16x4xf32, #tpu.memory_space<vmem>>, vector<8x4xf32>,
    return
  }
}

</mosaic_0001>

<bundles_post_ra>
// kernel: model_bio_modified_forward.1
= control target key start
LH: loop header
LB: loop body
LE: loop exit
PB: predicated region body
PF: predicated region fallthrough
CT: control target
= control target key end

     0   :  { %16 = vsyncpa [#allocation3], 0  ;;  %s3988_s0 = inlined_call_operand.vmem [shape: f32[2,8,4], index: 0, kind: input, shape index: {}]   ;;  %s3989_s1 = inlined_call_operand.hbm [shape: bf16[4,32], index: 1, kind: input, shape index: {}]   ;;  %s3990_s2 = inlined_call_operand.hbm [shape: bf16[32,32], index: 2, kind: input, shape index: {}]   ;;  %s3991_s3 = inlined_call_operand.hbm [shape: f32[1,32], index: 3, kind: input, shape index: {}]   ;;  %s3992_s4 = inlined_call_operand.hbm [shape: bf16[32,32], index: 4, kind: input, shape index: {}]   ;;  %s3993_s5 = inlined_call_operand.vmem [shape: bf16[32,32], index: 5, kind: input, shape index: {}]   ;;  %s3994_s6 = inlined_call_operand.vmem [shape: f32[1,32], index: 6, kind: input, shape index: {}]   ;;  %s3995_s7 = inlined_call_operand.vmem [shape: bf16[32,4], index: 7, kind: input, shape index: {}]   ;;  %s3996_s8 = inlined_call_operand.vmem [shape: f32[1,4], index: 8, kind: input, shape index: {}]   ;;  %s3997_s9 = inlined_call_operand.vmem [shape: f32[16,4], index: 9, kind: output, shape index: {0}]   ;;  %s3998_s10 = inlined_call_operand.hbm [shape: f32[2,2,32], index: 10, kind: output, shape index: {1}]  }
   0x1   :  { %17 = vsyncpa [#allocation6], 0 }
   0x2   :  { %18 = vsyncpa [#allocation9], 0 }
   0x3   :  { %19 = vsyncpa [#allocation4], 0  ;;  %s3400_s13 = smov [#allocation5]  }
   0x4   :  { %s37_s14 = sshll.u32 %s3400_s13, 4  ;;  %s38_s14 = int_to_ptr.vmem [resolvable:$true] %s37_s14 }
   0x5   :  { %s3300_s15 = scalar_lea.vmem %s38_s14, 256  ;;  %p3305_p1 = scmp.lt.s32.totalorder %s38_s14, %s38_s14 }
   0x6   :  { %p3301_p0 = scmp.ne.s32.totalorder %s38_s14, %s3300_s15  ;;  %p3306_p2 = scmp.lt.s32.totalorder %s3300_s15, %s3300_s15 }
   0x8   :  { %p3307_p3 = por %p3306_p2, %p3305_p1 }
   0xa   :  { %p3308_p4 = pnand %p3307_p3, %p3301_p0 }
   0xc   :  { %3311 = shalt.err (!%p3308_p4)
}
   0xd   :  { %s3401_s16 = smov 64   ;;  %s3402_s17 = smov 4  }
   0xe   :  { %43 = dma.hbm_to_vmem [thread:$0]  %s3990_s2, 256, %s38_s14, [#allocation6], %s3401_s16, %s3401_s16, %s3402_s17  }
   0xf   :  { %s3403_s20 = smov [#allocation2]   ;;  %s3404_s22 = smov [#allocation7]  }
  0x10   :  { %s28_s21 = sshll.u32 %s3403_s20, 4  ;;  %s50_s23 = sshll.u32 %s3404_s22, 4  ;;  %s29_s21 = int_to_ptr.vmem [resolvable:$true] %s28_s21  ;;  %s51_s23 = int_to_ptr.vmem [resolvable:$true] %s50_s23 }
  0x11   :  { %s3320_s24 = scalar_lea.vmem %s29_s21, 32  ;;  %p3325_p6 = scmp.lt.s32.totalorder %s29_s21, %s29_s21 }
  0x12   :  { %p3321_p5 = scmp.ne.s32.totalorder %s29_s21, %s3320_s24  ;;  %p3326_p7 = scmp.lt.s32.totalorder %s3320_s24, %s3320_s24 }
  0x14   :  { %p3327_p8 = por %p3326_p7, %p3325_p6 }
  0x16   :  { %p3328_p9 = pnand %p3327_p8, %p3321_p5 }
  0x18   :  { %3331 = shalt.err (!%p3328_p9)
}
  0x19   :  { %31 = dma.hbm_to_vmem [thread:$0]  %s3989_s1, 32, %s29_s21, [#allocation3]  }
  0x1a   :  { %s3340_s27 = scalar_lea.vmem %s51_s23, 16  ;;  %s3344_s2 = scalar_lea.vmem %s51_s23, 32 }
  0x1b   :  { %p3341_p10 = scmp.ne.s32.totalorder %s51_s23, %s3340_s27  ;;  %p3345_p11 = scmp.lt.s32.totalorder %s51_s23, %s51_s23 }
  0x1c   :  { %p3346_p12 = scmp.lt.s32.totalorder %s3344_s2, %s3340_s27 }
  0x1e   :  { %p3347_p13 = por %p3346_p12, %p3345_p11 }
  0x20   :  { %p3348_p0 = pnand %p3347_p13, %p3341_p10 }
  0x22   :  { %3351 = shalt.err (!%p3348_p0)
}
  0x23   :  { %53 = dma.hbm_to_vmem [thread:$0]  %s3991_s3, 16, %s51_s23, [#allocation6]  }
  0x24   :  { %s3405_s30 = smov [#allocation8]  }
  0x25   :  { %s59_s11 = sshll.u32 %s3405_s30, 4  ;;  %s60_s11 = int_to_ptr.vmem [resolvable:$true] %s59_s11 }
  0x26   :  { %s3360_s12 = scalar_lea.vmem %s60_s11, 256  ;;  %p3365_p2 = scmp.lt.s32.totalorder %s60_s11, %s60_s11 }
  0x27   :  { %p3361_p1 = scmp.ne.s32.totalorder %s60_s11, %s3360_s12  ;;  %p3366_p3 = scmp.lt.s32.totalorder %s3360_s12, %s3360_s12 }
  0x29   :  { %p3367_p4 = por %p3366_p3, %p3365_p2 }
  0x2b   :  { %p3368_p5 = pnand %p3367_p4, %p3361_p1 }
  0x2d   :  { %3371 = shalt.err (!%p3368_p5)
}
  0x2e   :  { %65 = dma.hbm_to_vmem [thread:$0]  %s3992_s4, 256, %s60_s11, [#allocation9], %s3401_s16, %s3401_s16, %s3402_s17  }
  0x2f   :  { %3392 = dma.done.wait [#allocation3], 32  }
  0x30   :  { %3393 = vsyncadd [#allocation3], 4294967264 }
  0x31   :  { %3394 = dma.done.wait [#allocation6], 272  }
  0x32   :  { %3395 = vsyncadd [#allocation6], 4294967024 }
  0x33   :  { %3396 = dma.done.wait [#allocation9], 256  }
  0x34   :  { %3397 = vsyncadd [#allocation9], 4294967040  ;;  %v3406_v0 = vmov 0.0   ;;  %vm3407_vm0 = vmmov 0   ;;  %vm119_vm1 = vcmask 1041408   ;;  %v107_v2 = vld [vmem:[%s3988_s0] sm:$0xff] }
  0x35   :  { %2797 = vmatprep.subr.bf16.mxu0 %v3406_v0  ;;  %2803 = vmatprep.subr.bf16.mxu1 %v3406_v0  ;;  %v87_v1 = vld [vmem:[#allocation2] sm:$0x3]  ;;  %v2592_v3 = vld [vmem:[%s3988_s0 + $0x8] sm:$0xff]  ;;  %v108_v5 = vpack.c.bf16 %v107_v2, %v107_v2  ;;  %vm115_vm2 = vcmask 31744   ;;  %v3408_v9 = vmov 0   ;;  %vm221_vm3 = vcmask 261120  }
  0x36   :  { %2799 = vmatprep.mubr.msk.bf16.mxu0 %vm3407_vm0, %v3406_v0  ;;  %2805 = vmatprep.mubr.msk.bf16.mxu1 %vm3407_vm0, %v3406_v0  ;;  %v121_v4 = vsel %vm119_vm1, %v87_v1, 0  ;;  %v165_v6 = vpack.c.bf16 %v2592_v3, %v2592_v3  ;;  %v3498_v7 = vld [vmem:[#allocation5 + $0x8] sm:$0xff]   ;;  %v3502_v8 = vld [vmem:[#allocation5] sm:$0xff]   ;;  %v2590_v14 = vld [vmem:[#allocation7] ss:$0 sm:$0xff]  ;;  %vm2363_vm4 = vcmask 1040384  }
  0x37   :  { %2798 = vmatpush3.bf16.msra.mxu0 %v121_v4  ;;  %2804 = vmatpush3.bf16.msra.mxu1 %v121_v4  ;;  %v3533_v28 = vld [vmem:[%s3993_s5 + $0x8] sm:$0xff]   ;;  %v3535_v31 = vld [vmem:[#allocation8 + $0x8] sm:$0xff]   ;;  %v3547_v34 = vld [vmem:[#allocation8] sm:$0xff]   ;;  %vm2396_vm5 = vcmask 1042432   ;;  %vm2398_vm6 = vcmask 1043456   ;;  %vm2400_vm7 = vcmask 1044480  }
  0x38   :  { %2809 = vmatprep.subr.bf16.mxu0 %v3406_v0  ;;  %2817 = vmatprep.subr.bf16.mxu1 %v3406_v0  ;;  %v3543_v33 = vld [vmem:[%s3993_s5] sm:$0xff]   ;;  %vm2365_vm8 = vcmask 254976   ;;  %vm2402_vm9 = vcmask 1045504   ;;  %vm2404_vm10 = vcmask 1046528  }
  0x39   :  { %v3583_v48 = vld [vmem:[%s3994_s6] sm:$0x1] }
  0x3a   :  { %2800 = vmatmul.mubr.msk.bf16.vlgmr.msra.gmra.mxu0 %vm115_vm2, %v108_v5  ;;  %2806 = vmatmul.mubr.msk.bf16.vlgmr.msra.gmra.mxu1 %vm115_vm2, %v165_v6 }
  0x3b   :  { %2810 = vmatpush3.bf16.msra.mxu0 %v3498_v7  ;;  %2813 = vmatprep.mubr.msk.bf16.mxu0 %vm3407_vm0, %v3406_v0 }
  0x3c   :  { %2811 = vmatprep.subr.bf16.mxu0 %v3406_v0  ;;  %2818 = vmatpush3.bf16.msra.mxu1 %v3498_v7 }
  0x3d   :  { %2819 = vmatprep.subr.bf16.mxu1 %v3406_v0  ;;  %2821 = vmatprep.mubr.msk.bf16.mxu1 %vm3407_vm0, %v3406_v0 }
  0x3f   :  { %2812 = vmatpush3.bf16.msra.mxu0 %v3502_v8 }
  0x40   :  { %2825 = vmatprep.subr.bf16.mxu0 %v3406_v0  ;;  %2820 = vmatpush3.bf16.msra.mxu1 %v3502_v8 }
  0x41   :  { %2833 = vmatprep.subr.bf16.mxu1 %v3406_v0 }
  0x42   :  { %2814 = vmatmul.mubr.bf16.vlgmr.msra.gmra.mxu0 %v3408_v9 }
  0x43   :  { %2826 = vmatpush3.bf16.msra.mxu0 %v3498_v7  ;;  %2829 = vmatprep.mubr.msk.bf16.mxu0 %vm3407_vm0, %v3406_v0 }
  0x44   :  { %2827 = vmatprep.subr.bf16.mxu0 %v3406_v0 }
  0x47   :  { %2828 = vmatpush3.bf16.msra.mxu0 %v3502_v8 }
  0x48   :  { %2841 = vmatprep.subr.bf16.mxu0 %v3406_v0 }
  0xfa   :  { %v157_v10 = vpop.f32.mrf.mxu0  ;;  %v203_v11 = vpop.f32.mrf.mxu1 }
  0xfb   :  { %v3524_v17 = vadd.f32 %v2590_v14, %v203_v11  ;;  %v3526_v20 = vadd.f32 %v2590_v14, %v157_v10 }
  0xfc   :  { %v2801_v12 = vpop.f32.mrf.mxu0  ;;  %v2807_v13 = vpop.f32.mrf.mxu1 }
  0xfe   :  { %v160_v15 = vpop.f32.mrf.mxu0  ;;  %v206_v16 = vpop.f32.mrf.mxu1 }
 0x100   :  { %v2802_v18 = vpop.f32.mrf.mxu0  ;;  %v2808_v19 = vpop.f32.mrf.mxu1 }
 0x102   :  { %v259_v21 = vpop.f32.mrf.mxu0 }
 0x103   :  { %v265_v22 = vadd.f32 %v259_v21, %v3526_v20  ;;  %v267_v23 = vadd.f32 %v259_v21, %v3524_v17 }
 0x104   :  { %v2815_v24 = vpop.f32.mrf.mxu0 }
 0x105   :  { %3213 = vtanh.f32 %v265_v22 }
 0x106   :  { %3215 = vtanh.f32 %v267_v23  ;;  %v262_v25 = vpop.f32.mrf.mxu0 }
 0x108   :  { %v2816_v26 = vpop.f32.mrf.mxu0 }
 0x112   :  { %v3214_v27 = vpop.eup %3213 }
 0x113   :  { %v3216_v29 = vpop.eup %3215  ;;  %v269_v30 = vpack.c.bf16 %v3214_v27, %v3214_v27 }
 0x114   :  { %v318_v32 = vpack.c.bf16 %v3216_v29, %v3216_v29 }
 0x115   :  { %2822 = vmatmul.mubr.msk.bf16.vlgmr.msra.gmra.mxu1 %vm221_vm3, %v269_v30 }
 0x116   :  { %2830 = vmatmul.mubr.msk.bf16.vlgmr.msra.gmra.mxu0 %vm221_vm3, %v318_v32  ;;  %2834 = vmatpush3.bf16.msra.mxu1 %v3533_v28 }
 0x117   :  { %2842 = vmatpush3.bf16.msra.mxu0 %v3535_v31  ;;  %2835 = vmatprep.subr.bf16.mxu1 %v3406_v0 }
 0x118   :  { %2843 = vmatprep.subr.bf16.mxu0 %v3406_v0  ;;  %2837 = vmatprep.mubr.msk.bf16.mxu1 %vm3407_vm0, %v3406_v0 }
 0x119   :  { %2845 = vmatprep.mubr.msk.bf16.mxu0 %vm3407_vm0, %v3406_v0 }
 0x11a   :  { %2836 = vmatpush3.bf16.msra.mxu1 %v3543_v33 }
 0x11b   :  { %2844 = vmatpush3.bf16.msra.mxu0 %v3547_v34  ;;  %2849 = vmatprep.subr.bf16.mxu1 %v3406_v0 }
 0x11c   :  { %2857 = vmatprep.subr.bf16.mxu0 %v3406_v0 }
 0x11d   :  { %2838 = vmatmul.mubr.bf16.vlgmr.msra.gmra.mxu1 %v3408_v9 }
 0x11e   :  { %2846 = vmatmul.mubr.msk.bf16.vlgmr.msra.gmra.mxu0 %vm221_vm3, %v269_v30  ;;  %2850 = vmatpush3.bf16.msra.mxu1 %v3535_v31 }
 0x11f   :  { %2851 = vmatprep.subr.bf16.mxu1 %v3406_v0  ;;  %2853 = vmatprep.mubr.msk.bf16.mxu1 %vm3407_vm0, %v3406_v0 }
 0x120   :  { %2858 = vmatpush3.bf16.msra.mxu0 %v3498_v7  ;;  %2861 = vmatprep.mubr.msk.bf16.mxu0 %vm3407_vm0, %v3406_v0 }
 0x121   :  { %2859 = vmatprep.subr.bf16.mxu0 %v3406_v0 }
 0x122   :  { %2852 = vmatpush3.bf16.msra.mxu1 %v3547_v34 }
 0x123   :  { %2865 = vmatprep.subr.bf16.mxu1 %v3406_v0 }
 0x124   :  { %2860 = vmatpush3.bf16.msra.mxu0 %v3502_v8 }
 0x125   :  { %2854 = vmatmul.mubr.msk.bf16.vlgmr.msra.gmra.mxu1 %vm221_vm3, %v318_v32  ;;  %2873 = vmatprep.subr.bf16.mxu0 %v3406_v0 }
 0x126   :  { %2866 = vmatpush3.bf16.msra.mxu1 %v3498_v7  ;;  %2869 = vmatprep.mubr.msk.bf16.mxu1 %vm3407_vm0, %v3406_v0 }
 0x127   :  { %2867 = vmatprep.subr.bf16.mxu1 %v3406_v0 }
 0x12a   :  { %2868 = vmatpush3.bf16.msra.mxu1 %v3502_v8 }
 0x12b   :  { %2881 = vmatprep.subr.bf16.mxu1 %v3406_v0 }
 0x1d5   :  { %v307_v35 = vpop.f32.mrf.mxu1 }
 0x1d6   :  { %v314_v36 = vrot.slane %v307_v35, 7  ;;  %v356_v37 = vpop.f32.mrf.mxu0 }
 0x1d7   :  { %v363_v38 = vrot.slane %v356_v37, 7  ;;  %v2823_v39 = vpop.f32.mrf.mxu1 }
 0x1d8   :  { %v316_v40 = vadd.f32 %v314_v36, %v3526_v20  ;;  %v2831_v41 = vpop.f32.mrf.mxu0 }
 0x1d9   :  { %v365_v42 = vadd.f32 %v363_v38, %v3524_v17  ;;  %v310_v43 = vpop.f32.mrf.mxu1 }
 0x1da   :  { %3217 = vtanh.f32 %v316_v40  ;;  %v359_v44 = vpop.f32.mrf.mxu0 }
 0x1db   :  { %3219 = vtanh.f32 %v365_v42  ;;  %v2824_v45 = vpop.f32.mrf.mxu1 }
 0x1dc   :  { %v2832_v46 = vpop.f32.mrf.mxu0 }
 0x1dd   :  { %v413_v47 = vpop.f32.mrf.mxu1 }
 0x1de   :  { %v465_v49 = vpop.f32.mrf.mxu0 }
 0x1df   :  { %v466_v50 = vadd.f32 %v465_v49, %v413_v47  ;;  %v2839_v51 = vpop.f32.mrf.mxu1 }
 0x1e0   :  { %v2847_v52 = vpop.f32.mrf.mxu0 }
 0x1e1   :  { %v471_v53 = vadd.f32 %v466_v50, %v3583_v48  ;;  %v416_v54 = vpop.f32.mrf.mxu1 }
 0x1e2   :  { %v468_v55 = vpop.f32.mrf.mxu0 }
 0x1e3   :  { %3221 = vtanh.f32 %v471_v53  ;;  %v2840_v56 = vpop.f32.mrf.mxu1 }
 0x1e4   :  { %v2848_v57 = vpop.f32.mrf.mxu0 }
 0x1e5   :  { %v507_v58 = vpop.f32.mrf.mxu1 }
 0x1e6   :  { %v508_v59 = vadd.f32 %v507_v58, %v413_v47 }
 0x1e7   :  { %v3218_v60 = vpop.eup %3217  ;;  %v2855_v61 = vpop.f32.mrf.mxu1 }
 0x1e8   :  { %v3220_v62 = vpop.eup %3219  ;;  %v515_v63 = vpack.c.bf16 %v3218_v60, %v3218_v60  ;;  %v513_v1 = vadd.f32 %v508_v59, %v3583_v48 }
 0x1e9   :  { %v567_v2 = vpack.c.bf16 %v3220_v62, %v3220_v62  ;;  %v510_v3 = vpop.f32.mrf.mxu1 }
 0x1ea   :  { %v517_v4 = vshrl.u32 %v515_v63, 16  ;;  %3223 = vtanh.f32 %v513_v1 }
 0x1eb   :  { %v569_v5 = vshrl.u32 %v567_v2, 16  ;;  %v2856_v6 = vpop.f32.mrf.mxu1 }
 0x1ec   :  { %2862 = vmatmul.mubr.msk.bf16.vlgmr.msra.gmra.mxu0 %vm221_vm3, %v517_v4 }
 0x1ed   :  { %2870 = vmatmul.mubr.msk.bf16.vlgmr.msra.gmra.mxu1 %vm221_vm3, %v569_v5  ;;  %2874 = vmatpush3.bf16.msra.mxu0 %v3533_v28 }
 0x1ee   :  { %2882 = vmatpush3.bf16.msra.mxu1 %v3535_v31  ;;  %2875 = vmatprep.subr.bf16.mxu0 %v3406_v0 }
 0x1ef   :  { %2883 = vmatprep.subr.bf16.mxu1 %v3406_v0  ;;  %2877 = vmatprep.mubr.msk.bf16.mxu0 %vm3407_vm0, %v3406_v0 }
 0x1f0   :  { %v3595_v9 = vpop.eup %3221  ;;  %2885 = vmatprep.mubr.msk.bf16.mxu1 %vm3407_vm0, %v3406_v0 }
 0x1f1   :  { %2876 = vmatpush3.bf16.msra.mxu0 %v3543_v33  ;;  %v619_v10 = vpack.c.bf16 %v3595_v9, %v3595_v9 }
 0x1f2   :  { %2884 = vmatpush3.bf16.msra.mxu1 %v3547_v34  ;;  %2889 = vmatprep.subr.bf16.mxu0 %v3406_v0 }
 0x1f3   :  { %2897 = vmatprep.subr.bf16.mxu1 %v3406_v0 }
 0x1f4   :  { %2878 = vmatmul.mubr.msk.bf16.vlgmr.msra.gmra.mxu0 %vm221_vm3, %v619_v10 }
 0x1f5   :  { %2886 = vmatmul.mubr.msk.bf16.vlgmr.msra.gmra.mxu1 %vm221_vm3, %v517_v4  ;;  %2890 = vmatpush3.bf16.msra.mxu0 %v3533_v28 }
 0x1f6   :  { %2898 = vmatpush3.bf16.msra.mxu1 %v3535_v31  ;;  %2891 = vmatprep.subr.bf16.mxu0 %v3406_v0 }
 0x1f7   :  { %v3610_v11 = vpop.eup %3223  ;;  %2899 = vmatprep.subr.bf16.mxu1 %v3406_v0  ;;  %2893 = vmatprep.mubr.msk.bf16.mxu0 %vm3407_vm0, %v3406_v0 }
 0x1f8   :  { %2901 = vmatprep.mubr.msk.bf16.mxu1 %vm3407_vm0, %v3406_v0  ;;  %v705_v12 = vpack.c.bf16 %v3610_v11, %v3610_v11 }
 0x1f9   :  { %2892 = vmatpush3.bf16.msra.mxu0 %v3543_v33 }
 0x1fa   :  { %2900 = vmatpush3.bf16.msra.mxu1 %v3547_v34  ;;  %2905 = vmatprep.subr.bf16.mxu0 %v3406_v0 }
 0x1fb   :  { %2913 = vmatprep.subr.bf16.mxu1 %v3406_v0 }
 0x1fc   :  { %2894 = vmatmul.mubr.msk.bf16.vlgmr.msra.gmra.mxu0 %vm221_vm3, %v705_v12 }
 0x1fd   :  { %2902 = vmatmul.mubr.msk.bf16.vlgmr.msra.gmra.mxu1 %vm221_vm3, %v569_v5  ;;  %2906 = vmatpush3.bf16.msra.mxu0 %v3498_v7 }
 0x1fe   :  { %2914 = vmatpush3.bf16.msra.mxu1 %v3498_v7  ;;  %2907 = vmatprep.subr.bf16.mxu0 %v3406_v0 }
 0x1ff   :  { %2915 = vmatprep.subr.bf16.mxu1 %v3406_v0  ;;  %2909 = vmatprep.mubr.msk.bf16.mxu0 %vm3407_vm0, %v3406_v0 }
 0x200   :  { %2917 = vmatprep.mubr.msk.bf16.mxu1 %vm3407_vm0, %v3406_v0 }
 0x201   :  { %2908 = vmatpush3.bf16.msra.mxu0 %v3502_v8 }
 0x202   :  { %2916 = vmatpush3.bf16.msra.mxu1 %v3502_v8  ;;  %2921 = vmatprep.subr.bf16.mxu0 %v3406_v0 }
 0x203   :  { %2929 = vmatprep.subr.bf16.mxu1 %v3406_v0 }
 0x2ac   :  { %v556_v13 = vpop.f32.mrf.mxu0 }
 0x2ad   :  { %v563_v14 = vrot.slane %v556_v13, 6  ;;  %v608_v15 = vpop.f32.mrf.mxu1 }
 0x2ae   :  { %v615_v16 = vrot.slane %v608_v15, 6  ;;  %v2863_v18 = vpop.f32.mrf.mxu0 }
 0x2af   :  { %v565_v19 = vadd.f32 %v563_v14, %v3526_v20  ;;  %v2871_v21 = vpop.f32.mrf.mxu1 }
 0x2b0   :  { %v617_v22 = vadd.f32 %v615_v16, %v3524_v17  ;;  %v559_v23 = vpop.f32.mrf.mxu0 }
 0x2b1   :  { %3225 = vtanh.f32 %v565_v19  ;;  %v611_v24 = vpop.f32.mrf.mxu1 }
 0x2b2   :  { %3227 = vtanh.f32 %v617_v22  ;;  %v2864_v25 = vpop.f32.mrf.mxu0 }
 0x2b3   :  { %v2872_v26 = vpop.f32.mrf.mxu1 }
 0x2b4   :  { %v657_v27 = vpop.f32.mrf.mxu0 }
 0x2b5   :  { %v697_v29 = vpop.f32.mrf.mxu1 }
 0x2b6   :  { %v698_v30 = vadd.f32 %v697_v29, %v657_v27  ;;  %v2879_v32 = vpop.f32.mrf.mxu0 }
 0x2b7   :  { %v2887_v35 = vpop.f32.mrf.mxu1 }
 0x2b8   :  { %v703_v36 = vadd.f32 %v698_v30, %v3583_v48  ;;  %v660_v37 = vpop.f32.mrf.mxu0 }
 0x2b9   :  { %v700_v38 = vpop.f32.mrf.mxu1 }
 0x2ba   :  { %3229 = vtanh.f32 %v703_v36  ;;  %v2880_v39 = vpop.f32.mrf.mxu0 }
 0x2bb   :  { %v2888_v40 = vpop.f32.mrf.mxu1 }
 0x2bc   :  { %v743_v41 = vpop.f32.mrf.mxu0 }
 0x2bd   :  { %v783_v42 = vpop.f32.mrf.mxu1 }
 0x2be   :  { %v3226_v43 = vpop.eup %3225  ;;  %v784_v44 = vadd.f32 %v783_v42, %v743_v41  ;;  %v2895_v45 = vpop.f32.mrf.mxu0 }
 0x2bf   :  { %v3228_v46 = vpop.eup %3227  ;;  %v791_v47 = vpack.c.bf16 %v3226_v43, %v3226_v43  ;;  %v2903_v49 = vpop.f32.mrf.mxu1 }
 0x2c0   :  { %v842_v50 = vpack.c.bf16 %v3228_v46, %v3228_v46  ;;  %v789_v51 = vadd.f32 %v784_v44, %v3583_v48  ;;  %v746_v52 = vpop.f32.mrf.mxu0 }
 0x2c1   :  { %v793_v53 = vrot.slane %v791_v47, 1  ;;  %v786_v54 = vpop.f32.mrf.mxu1 }
 0x2c2   :  { %v844_v55 = vrot.slane %v842_v50, 1  ;;  %3231 = vtanh.f32 %v789_v51  ;;  %v2896_v56 = vpop.f32.mrf.mxu0 }
 0x2c3   :  { %v2904_v57 = vpop.f32.mrf.mxu1  ;;  %2910 = vmatmul.mubr.msk.bf16.vlgmr.msra.gmra.mxu0 %vm221_vm3, %v793_v53 }
 0x2c4   :  { %2918 = vmatmul.mubr.msk.bf16.vlgmr.msra.gmra.mxu1 %vm221_vm3, %v844_v55  ;;  %2922 = vmatpush3.bf16.msra.mxu0 %v3533_v28 }
 0x2c5   :  { %2930 = vmatpush3.bf16.msra.mxu1 %v3535_v31  ;;  %2923 = vmatprep.subr.bf16.mxu0 %v3406_v0 }
 0x2c6   :  { %2931 = vmatprep.subr.bf16.mxu1 %v3406_v0  ;;  %2925 = vmatprep.mubr.msk.bf16.mxu0 %vm3407_vm0, %v3406_v0 }
 0x2c7   :  { %v3649_v58 = vpop.eup %3229  ;;  %2933 = vmatprep.mubr.msk.bf16.mxu1 %vm3407_vm0, %v3406_v0 }
 0x2c8   :  { %2924 = vmatpush3.bf16.msra.mxu0 %v3543_v33  ;;  %v893_v59 = vpack.c.bf16 %v3649_v58, %v3649_v58  ;;  %v2374_v50 = vrot.slane %v3649_v58, 7 }
 0x2c9   :  { %2932 = vmatpush3.bf16.msra.mxu1 %v3547_v34  ;;  %2937 = vmatprep.subr.bf16.mxu0 %v3406_v0 }
 0x2ca   :  { %2945 = vmatprep.subr.bf16.mxu1 %v3406_v0 }
 0x2cb   :  { %2926 = vmatmul.mubr.msk.bf16.vlgmr.msra.gmra.mxu0 %vm221_vm3, %v893_v59 }
 0x2cc   :  { %2934 = vmatmul.mubr.msk.bf16.vlgmr.msra.gmra.mxu1 %vm221_vm3, %v793_v53  ;;  %2938 = vmatpush3.bf16.msra.mxu0 %v3533_v28  ;;  %v2394_v53 = vsel %vm2363_vm4, %v3595_v9, %v2374_v50 }
 0x2cd   :  { %2946 = vmatpush3.bf16.msra.mxu1 %v3535_v31  ;;  %2939 = vmatprep.subr.bf16.mxu0 %v3406_v0 }
 0x2ce   :  { %2947 = vmatprep.subr.bf16.mxu1 %v3406_v0  ;;  %2941 = vmatprep.mubr.msk.bf16.mxu0 %vm3407_vm0, %v3406_v0 }
 0x2cf   :  { %v3667_v60 = vpop.eup %3231  ;;  %2949 = vmatprep.mubr.msk.bf16.mxu1 %vm3407_vm0, %v3406_v0 }
 0x2d0   :  { %2940 = vmatpush3.bf16.msra.mxu0 %v3543_v33  ;;  %v979_v61 = vpack.c.bf16 %v3667_v60, %v3667_v60  ;;  %v2483_v56 = vrot.slane %v3667_v60, 7 }
 0x2d1   :  { %2948 = vmatpush3.bf16.msra.mxu1 %v3547_v34  ;;  %2953 = vmatprep.subr.bf16.mxu0 %v3406_v0 }
 0x2d2   :  { %2961 = vmatprep.subr.bf16.mxu1 %v3406_v0  ;;  %v2502_v58 = vsel %vm2363_vm4, %v3610_v11, %v2483_v56 }
 0x2d3   :  { %2942 = vmatmul.mubr.msk.bf16.vlgmr.msra.gmra.mxu0 %vm221_vm3, %v979_v61 }
 0x2d4   :  { %2950 = vmatmul.mubr.msk.bf16.vlgmr.msra.gmra.mxu1 %vm221_vm3, %v844_v55  ;;  %2954 = vmatpush3.bf16.msra.mxu0 %v3498_v7 }
 0x2d5   :  { %2962 = vmatpush3.bf16.msra.mxu1 %v3498_v7  ;;  %2955 = vmatprep.subr.bf16.mxu0 %v3406_v0 }
 0x2d6   :  { %2963 = vmatprep.subr.bf16.mxu1 %v3406_v0  ;;  %2957 = vmatprep.mubr.msk.bf16.mxu0 %vm3407_vm0, %v3406_v0 }
 0x2d7   :  { %2965 = vmatprep.mubr.msk.bf16.mxu1 %vm3407_vm0, %v3406_v0 }
 0x2d8   :  { %2956 = vmatpush3.bf16.msra.mxu0 %v3502_v8 }
 0x2d9   :  { %2964 = vmatpush3.bf16.msra.mxu1 %v3502_v8  ;;  %2969 = vmatprep.subr.bf16.mxu0 %v3406_v0 }
 0x2da   :  { %2977 = vmatprep.subr.bf16.mxu1 %v3406_v0 }
 0x383   :  { %v831_v62 = vpop.f32.mrf.mxu0 }
 0x384   :  { %v838_v63 = vrot.slane %v831_v62, 5  ;;  %v882_v1 = vpop.f32.mrf.mxu1 }
 0x385   :  { %v889_v2 = vrot.slane %v882_v1, 5  ;;  %v2911_v3 = vpop.f32.mrf.mxu0 }
 0x386   :  { %v840_v4 = vadd.f32 %v838_v63, %v3526_v20  ;;  %v2919_v5 = vpop.f32.mrf.mxu1 }
 0x387   :  { %v891_v6 = vadd.f32 %v889_v2, %v3524_v17  ;;  %v834_v10 = vpop.f32.mrf.mxu0 }
 0x388   :  { %3233 = vtanh.f32 %v840_v4  ;;  %v885_v12 = vpop.f32.mrf.mxu1 }
 0x389   :  { %3235 = vtanh.f32 %v891_v6  ;;  %v2912_v13 = vpop.f32.mrf.mxu0 }
 0x38a   :  { %v2920_v14 = vpop.f32.mrf.mxu1 }
 0x38b   :  { %v931_v15 = vpop.f32.mrf.mxu0 }
 0x38c   :  { %v971_v16 = vpop.f32.mrf.mxu1 }
 0x38d   :  { %v972_v18 = vadd.f32 %v971_v16, %v931_v15  ;;  %v2927_v19 = vpop.f32.mrf.mxu0 }
 0x38e   :  { %v2935_v21 = vpop.f32.mrf.mxu1 }
 0x38f   :  { %v977_v22 = vadd.f32 %v972_v18, %v3583_v48  ;;  %v934_v23 = vpop.f32.mrf.mxu0 }
 0x390   :  { %v974_v24 = vpop.f32.mrf.mxu1 }
 0x391   :  { %3237 = vtanh.f32 %v977_v22  ;;  %v2928_v25 = vpop.f32.mrf.mxu0 }
 0x392   :  { %v2936_v26 = vpop.f32.mrf.mxu1 }
 0x393   :  { %v1017_v27 = vpop.f32.mrf.mxu0 }
 0x394   :  { %v1057_v29 = vpop.f32.mrf.mxu1 }
 0x395   :  { %v3234_v30 = vpop.eup %3233  ;;  %v1058_v32 = vadd.f32 %v1057_v29, %v1017_v27  ;;  %v2943_v35 = vpop.f32.mrf.mxu0 }
 0x396   :  { %v3236_v36 = vpop.eup %3235  ;;  %v1065_v37 = vpack.c.bf16 %v3234_v30, %v3234_v30  ;;  %v2951_v38 = vpop.f32.mrf.mxu1 }
 0x397   :  { %v1118_v39 = vpack.c.bf16 %v3236_v36, %v3236_v36  ;;  %v1063_v40 = vadd.f32 %v1058_v32, %v3583_v48  ;;  %v1020_v41 = vpop.f32.mrf.mxu0 }
 0x398   :  { %v1067_v42 = vshrl.u32 %v1065_v37, 16  ;;  %v1060_v43 = vpop.f32.mrf.mxu1 }
 0x399   :  { %v1120_v44 = vshrl.u32 %v1118_v39, 16  ;;  %3239 = vtanh.f32 %v1063_v40  ;;  %v2944_v45 = vpop.f32.mrf.mxu0 }
 0x39a   :  { %v1069_v46 = vrot.slane %v1067_v42, 1  ;;  %v2952_v47 = vpop.f32.mrf.mxu1 }
 0x39b   :  { %v1122_v49 = vrot.slane %v1120_v44, 1 }
 0x39c   :  { %2958 = vmatmul.mubr.msk.bf16.vlgmr.msra.gmra.mxu0 %vm221_vm3, %v1069_v46 }
 0x39d   :  { %2966 = vmatmul.mubr.msk.bf16.vlgmr.msra.gmra.mxu1 %vm221_vm3, %v1122_v49  ;;  %2970 = vmatpush3.bf16.msra.mxu0 %v3533_v28 }
 0x39e   :  { %v3238_v51 = vpop.eup %3237  ;;  %2978 = vmatpush3.bf16.msra.mxu1 %v3535_v31  ;;  %2971 = vmatprep.subr.bf16.mxu0 %v3406_v0 }
 0x39f   :  { %v2377_v52 = vrot.slane %v3238_v51, 6  ;;  %2979 = vmatprep.subr.bf16.mxu1 %v3406_v0  ;;  %2973 = vmatprep.mubr.msk.bf16.mxu0 %vm3407_vm0, %v3406_v0  ;;  %v1171_v55 = vpack.c.bf16 %v3238_v51, %v3238_v51 }
 0x3a0   :  { %2981 = vmatprep.mubr.msk.bf16.mxu1 %vm3407_vm0, %v3406_v0 }
 0x3a1   :  { %v3709_v54 = vsel %vm119_vm1, %v2394_v53, %v2377_v52  ;;  %2972 = vmatpush3.bf16.msra.mxu0 %v3543_v33 }
 0x3a2   :  { %2980 = vmatpush3.bf16.msra.mxu1 %v3547_v34  ;;  %2985 = vmatprep.subr.bf16.mxu0 %v3406_v0 }
 0x3a3   :  { %2993 = vmatprep.subr.bf16.mxu1 %v3406_v0 }
 0x3a4   :  { %2974 = vmatmul.mubr.msk.bf16.vlgmr.msra.gmra.mxu0 %vm221_vm3, %v1171_v55 }
 0x3a5   :  { %2982 = vmatmul.mubr.msk.bf16.vlgmr.msra.gmra.mxu1 %vm221_vm3, %v1069_v46  ;;  %2986 = vmatpush3.bf16.msra.mxu0 %v3533_v28 }
 0x3a6   :  { %v3240_v9 = vpop.eup %3239  ;;  %2994 = vmatpush3.bf16.msra.mxu1 %v3535_v31  ;;  %2987 = vmatprep.subr.bf16.mxu0 %v3406_v0 }
 0x3a7   :  { %v2486_v57 = vrot.slane %v3240_v9, 6  ;;  %2995 = vmatprep.subr.bf16.mxu1 %v3406_v0  ;;  %2989 = vmatprep.mubr.msk.bf16.mxu0 %vm3407_vm0, %v3406_v0  ;;  %v1257_v60 = vpack.c.bf16 %v3240_v9, %v3240_v9 }
 0x3a8   :  { %2997 = vmatprep.mubr.msk.bf16.mxu1 %vm3407_vm0, %v3406_v0 }
 0x3a9   :  { %v3729_v59 = vsel %vm119_vm1, %v2502_v58, %v2486_v57  ;;  %2988 = vmatpush3.bf16.msra.mxu0 %v3543_v33 }
 0x3aa   :  { %2996 = vmatpush3.bf16.msra.mxu1 %v3547_v34  ;;  %3001 = vmatprep.subr.bf16.mxu0 %v3406_v0 }
 0x3ab   :  { %3009 = vmatprep.subr.bf16.mxu1 %v3406_v0 }
 0x3ac   :  { %2990 = vmatmul.mubr.msk.bf16.vlgmr.msra.gmra.mxu0 %vm221_vm3, %v1257_v60 }
 0x3ad   :  { %2998 = vmatmul.mubr.msk.bf16.vlgmr.msra.gmra.mxu1 %vm221_vm3, %v1122_v49  ;;  %3002 = vmatpush3.bf16.msra.mxu0 %v3498_v7 }
 0x3ae   :  { %3010 = vmatpush3.bf16.msra.mxu1 %v3498_v7  ;;  %3003 = vmatprep.subr.bf16.mxu0 %v3406_v0 }
 0x3af   :  { %3011 = vmatprep.subr.bf16.mxu1 %v3406_v0  ;;  %3005 = vmatprep.mubr.msk.bf16.mxu0 %vm3407_vm0, %v3406_v0 }
 0x3b0   :  { %3013 = vmatprep.mubr.msk.bf16.mxu1 %vm3407_vm0, %v3406_v0 }
 0x3b1   :  { %3004 = vmatpush3.bf16.msra.mxu0 %v3502_v8 }
 0x3b2   :  { %3012 = vmatpush3.bf16.msra.mxu1 %v3502_v8  ;;  %3017 = vmatprep.subr.bf16.mxu0 %v3406_v0 }
 0x3b3   :  { %3025 = vmatprep.subr.bf16.mxu1 %v3406_v0 }
 0x45c   :  { %v1107_v11 = vpop.f32.mrf.mxu0 }
 0x45d   :  { %v1114_v61 = vrot.slane %v1107_v11, 4  ;;  %v1160_v62 = vpop.f32.mrf.mxu1 }
 0x45e   :  { %v1167_v63 = vrot.slane %v1160_v62, 4  ;;  %v2959_v1 = vpop.f32.mrf.mxu0 }
 0x45f   :  { %v1116_v2 = vadd.f32 %v1114_v61, %v3526_v20  ;;  %v2967_v3 = vpop.f32.mrf.mxu1 }
 0x460   :  { %v1169_v4 = vadd.f32 %v1167_v63, %v3524_v17  ;;  %v1110_v5 = vpop.f32.mrf.mxu0 }
 0x461   :  { %3241 = vtanh.f32 %v1116_v2  ;;  %v1163_v6 = vpop.f32.mrf.mxu1 }
 0x462   :  { %3243 = vtanh.f32 %v1169_v4  ;;  %v2960_v10 = vpop.f32.mrf.mxu0 }
 0x463   :  { %v2968_v12 = vpop.f32.mrf.mxu1 }
 0x464   :  { %v1209_v13 = vpop.f32.mrf.mxu0 }
 0x465   :  { %v1249_v14 = vpop.f32.mrf.mxu1 }
 0x466   :  { %v1250_v15 = vadd.f32 %v1249_v14, %v1209_v13  ;;  %v2975_v16 = vpop.f32.mrf.mxu0 }
 0x467   :  { %v2983_v18 = vpop.f32.mrf.mxu1 }
 0x468   :  { %v1255_v19 = vadd.f32 %v1250_v15, %v3583_v48  ;;  %v1212_v21 = vpop.f32.mrf.mxu0 }
 0x469   :  { %v1252_v22 = vpop.f32.mrf.mxu1 }
 0x46a   :  { %3245 = vtanh.f32 %v1255_v19  ;;  %v2976_v23 = vpop.f32.mrf.mxu0 }
 0x46b   :  { %v2984_v24 = vpop.f32.mrf.mxu1 }
 0x46c   :  { %v1295_v25 = vpop.f32.mrf.mxu0 }
 0x46d   :  { %v1335_v26 = vpop.f32.mrf.mxu1 }
 0x46e   :  { %v3242_v27 = vpop.eup %3241  ;;  %v1336_v29 = vadd.f32 %v1335_v26, %v1295_v25  ;;  %v2991_v30 = vpop.f32.mrf.mxu0 }
 0x46f   :  { %v3244_v32 = vpop.eup %3243  ;;  %v1343_v35 = vpack.c.bf16 %v3242_v27, %v3242_v27  ;;  %v2999_v36 = vpop.f32.mrf.mxu1 }
 0x470   :  { %v1394_v37 = vpack.c.bf16 %v3244_v32, %v3244_v32  ;;  %v1341_v38 = vadd.f32 %v1336_v29, %v3583_v48  ;;  %v1298_v39 = vpop.f32.mrf.mxu0 }
 0x471   :  { %v1345_v40 = vrot.slane %v1343_v35, 2  ;;  %v1338_v41 = vpop.f32.mrf.mxu1 }
 0x472   :  { %v1396_v42 = vrot.slane %v1394_v37, 2  ;;  %3247 = vtanh.f32 %v1341_v38  ;;  %v2992_v43 = vpop.f32.mrf.mxu0 }
 0x473   :  { %v3000_v44 = vpop.f32.mrf.mxu1  ;;  %3006 = vmatmul.mubr.msk.bf16.vlgmr.msra.gmra.mxu0 %vm221_vm3, %v1345_v40 }
 0x474   :  { %3014 = vmatmul.mubr.msk.bf16.vlgmr.msra.gmra.mxu1 %vm221_vm3, %v1396_v42  ;;  %3018 = vmatpush3.bf16.msra.mxu0 %v3533_v28 }
 0x475   :  { %3026 = vmatpush3.bf16.msra.mxu1 %v3535_v31  ;;  %3019 = vmatprep.subr.bf16.mxu0 %v3406_v0 }
 0x476   :  { %3027 = vmatprep.subr.bf16.mxu1 %v3406_v0  ;;  %3021 = vmatprep.mubr.msk.bf16.mxu0 %vm3407_vm0, %v3406_v0 }
 0x477   :  { %v3246_v45 = vpop.eup %3245  ;;  %3029 = vmatprep.mubr.msk.bf16.mxu1 %vm3407_vm0, %v3406_v0 }
 0x478   :  { %v2380_v46 = vrot.slane %v3246_v45, 5  ;;  %3020 = vmatpush3.bf16.msra.mxu0 %v3543_v33  ;;  %v1445_v47 = vpack.c.bf16 %v3246_v45, %v3246_v45  ;;  %v3285_v45 = vld [vmem:[#allocation5 + $0x8] sm:$0xff]  }
 0x479   :  { %3028 = vmatpush3.bf16.msra.mxu1 %v3547_v34  ;;  %3033 = vmatprep.subr.bf16.mxu0 %v3406_v0 }
 0x47a   :  { %3041 = vmatprep.subr.bf16.mxu1 %v3406_v0  ;;  %v3769_v49 = vsel %vm2396_vm5, %v3709_v54, %v2380_v46 }
 0x47b   :  { %3022 = vmatmul.mubr.msk.bf16.vlgmr.msra.gmra.mxu0 %vm221_vm3, %v1445_v47 }
 0x47c   :  { %3030 = vmatmul.mubr.msk.bf16.vlgmr.msra.gmra.mxu1 %vm221_vm3, %v1345_v40  ;;  %3034 = vmatpush3.bf16.msra.mxu0 %v3533_v28 }
 0x47d   :  { %3042 = vmatpush3.bf16.msra.mxu1 %v3535_v31  ;;  %3035 = vmatprep.subr.bf16.mxu0 %v3406_v0 }
 0x47e   :  { %3043 = vmatprep.subr.bf16.mxu1 %v3406_v0  ;;  %3037 = vmatprep.mubr.msk.bf16.mxu0 %vm3407_vm0, %v3406_v0 }
 0x47f   :  { %v3248_v50 = vpop.eup %3247  ;;  %3045 = vmatprep.mubr.msk.bf16.mxu1 %vm3407_vm0, %v3406_v0 }
 0x480   :  { %v2489_v51 = vrot.slane %v3248_v50, 5  ;;  %3036 = vmatpush3.bf16.msra.mxu0 %v3543_v33  ;;  %v1531_v52 = vpack.c.bf16 %v3248_v50, %v3248_v50 }
 0x481   :  { %3044 = vmatpush3.bf16.msra.mxu1 %v3547_v34  ;;  %3049 = vmatprep.subr.bf16.mxu0 %v3406_v0 }
 0x482   :  { %3057 = vmatprep.subr.bf16.mxu1 %v3406_v0  ;;  %v3787_v53 = vsel %vm2396_vm5, %v3729_v59, %v2489_v51 }
 0x483   :  { %3038 = vmatmul.mubr.msk.bf16.vlgmr.msra.gmra.mxu0 %vm221_vm3, %v1531_v52 }
 0x484   :  { %3046 = vmatmul.mubr.msk.bf16.vlgmr.msra.gmra.mxu1 %vm221_vm3, %v1396_v42  ;;  %3050 = vmatpush3.bf16.msra.mxu0 %v3498_v7 }
 0x485   :  { %3058 = vmatpush3.bf16.msra.mxu1 %v3498_v7  ;;  %3051 = vmatprep.subr.bf16.mxu0 %v3406_v0 }
 0x486   :  { %3059 = vmatprep.subr.bf16.mxu1 %v3406_v0  ;;  %3053 = vmatprep.mubr.msk.bf16.mxu0 %vm3407_vm0, %v3406_v0 }
 0x487   :  { %3061 = vmatprep.mubr.msk.bf16.mxu1 %vm3407_vm0, %v3406_v0 }
 0x488   :  { %3052 = vmatpush3.bf16.msra.mxu0 %v3502_v8 }
 0x489   :  { %3060 = vmatpush3.bf16.msra.mxu1 %v3502_v8  ;;  %3065 = vmatprep.subr.bf16.mxu0 %v3406_v0 }
 0x48a   :  { %3073 = vmatprep.subr.bf16.mxu1 %v3406_v0 }
 0x533   :  { %v1383_v54 = vpop.f32.mrf.mxu0 }
 0x534   :  { %v1390_v7 = vrot.slane %v1383_v54, 3  ;;  %v1434_v55 = vpop.f32.mrf.mxu1 }
 0x535   :  { %v1441_v56 = vrot.slane %v1434_v55, 3  ;;  %v3007_v9 = vpop.f32.mrf.mxu0 }
 0x536   :  { %v1392_v57 = vadd.f32 %v1390_v7, %v3526_v20  ;;  %v3015_v58 = vpop.f32.mrf.mxu1 }
 0x537   :  { %v1443_v59 = vadd.f32 %v1441_v56, %v3524_v17  ;;  %v1386_v60 = vpop.f32.mrf.mxu0 }
 0x538   :  { %3249 = vtanh.f32 %v1392_v57  ;;  %v1437_v11 = vpop.f32.mrf.mxu1 }
 0x539   :  { %3251 = vtanh.f32 %v1443_v59  ;;  %v3008_v61 = vpop.f32.mrf.mxu0 }
 0x53a   :  { %v3016_v8 = vpop.f32.mrf.mxu1 }
 0x53b   :  { %v1483_v62 = vpop.f32.mrf.mxu0 }
 0x53c   :  { %v1523_v63 = vpop.f32.mrf.mxu1 }
 0x53d   :  { %v1524_v1 = vadd.f32 %v1523_v63, %v1483_v62  ;;  %v3023_v2 = vpop.f32.mrf.mxu0 }
 0x53e   :  { %v3031_v3 = vpop.f32.mrf.mxu1 }
 0x53f   :  { %v1529_v4 = vadd.f32 %v1524_v1, %v3583_v48  ;;  %v1486_v5 = vpop.f32.mrf.mxu0 }
 0x540   :  { %v1526_v6 = vpop.f32.mrf.mxu1 }
 0x541   :  { %3253 = vtanh.f32 %v1529_v4  ;;  %v3024_v10 = vpop.f32.mrf.mxu0 }
 0x542   :  { %v3032_v12 = vpop.f32.mrf.mxu1 }
 0x543   :  { %v1569_v13 = vpop.f32.mrf.mxu0 }
 0x544   :  { %v1609_v14 = vpop.f32.mrf.mxu1 }
 0x545   :  { %v3250_v15 = vpop.eup %3249  ;;  %v1610_v16 = vadd.f32 %v1609_v14, %v1569_v13  ;;  %v3039_v18 = vpop.f32.mrf.mxu0 }
 0x546   :  { %v3252_v19 = vpop.eup %3251  ;;  %v1617_v21 = vpack.c.bf16 %v3250_v15, %v3250_v15  ;;  %v3047_v22 = vpop.f32.mrf.mxu1 }
 0x547   :  { %v1670_v23 = vpack.c.bf16 %v3252_v19, %v3252_v19  ;;  %v1615_v24 = vadd.f32 %v1610_v16, %v3583_v48  ;;  %v1572_v25 = vpop.f32.mrf.mxu0 }
 0x548   :  { %v1619_v26 = vshrl.u32 %v1617_v21, 16  ;;  %v1612_v27 = vpop.f32.mrf.mxu1  ;;  %v3870_v25 = vld [vmem:[%s3993_s5] sm:$0xff]  }
 0x549   :  { %v1672_v29 = vshrl.u32 %v1670_v23, 16  ;;  %3255 = vtanh.f32 %v1615_v24  ;;  %v3040_v30 = vpop.f32.mrf.mxu0 }
 0x54a   :  { %v1621_v32 = vrot.slane %v1619_v26, 2  ;;  %v3048_v35 = vpop.f32.mrf.mxu1  ;;  %v3885_v26 = vld [vmem:[%s3993_s5 + $0x8] sm:$0xff]   ;;  %v3898_v30 = vld [vmem:[#allocation8] sm:$0xff]  }
 0x54b   :  { %v1674_v36 = vrot.slane %v1672_v29, 2 }
 0x54c   :  { %3054 = vmatmul.mubr.msk.bf16.vlgmr.msra.gmra.mxu0 %vm221_vm3, %v1621_v32 }
 0x54d   :  { %3062 = vmatmul.mubr.msk.bf16.vlgmr.msra.gmra.mxu1 %vm221_vm3, %v1674_v36  ;;  %3066 = vmatpush3.bf16.msra.mxu0 %v3533_v28 }
 0x54e   :  { %v3254_v37 = vpop.eup %3253  ;;  %3074 = vmatpush3.bf16.msra.mxu1 %v3535_v31  ;;  %3067 = vmatprep.subr.bf16.mxu0 %v3406_v0 }
 0x54f   :  { %v2383_v38 = vrot.slane %v3254_v37, 4  ;;  %3075 = vmatprep.subr.bf16.mxu1 %v3406_v0  ;;  %3069 = vmatprep.mubr.msk.bf16.mxu0 %vm3407_vm0, %v3406_v0  ;;  %v1723_v40 = vpack.c.bf16 %v3254_v37, %v3254_v37 }
 0x550   :  { %3077 = vmatprep.mubr.msk.bf16.mxu1 %vm3407_vm0, %v3406_v0 }
 0x551   :  { %3068 = vmatpush3.bf16.msra.mxu0 %v3543_v33  ;;  %v3820_v39 = vsel %vm2398_vm6, %v3769_v49, %v2383_v38 }
 0x552   :  { %3076 = vmatpush3.bf16.msra.mxu1 %v3547_v34  ;;  %3081 = vmatprep.subr.bf16.mxu0 %v3406_v0 }
 0x553   :  { %3089 = vmatprep.subr.bf16.mxu1 %v3406_v0 }
 0x554   :  { %3070 = vmatmul.mubr.msk.bf16.vlgmr.msra.gmra.mxu0 %vm221_vm3, %v1723_v40 }
 0x555   :  { %3078 = vmatmul.mubr.msk.bf16.vlgmr.msra.gmra.mxu1 %vm221_vm3, %v1621_v32  ;;  %3082 = vmatpush3.bf16.msra.mxu0 %v3533_v28 }
 0x556   :  { %v3256_v41 = vpop.eup %3255  ;;  %3090 = vmatpush3.bf16.msra.mxu1 %v3535_v31  ;;  %3083 = vmatprep.subr.bf16.mxu0 %v3406_v0 }
 0x557   :  { %v2492_v42 = vrot.slane %v3256_v41, 4  ;;  %3091 = vmatprep.subr.bf16.mxu1 %v3406_v0  ;;  %3085 = vmatprep.mubr.msk.bf16.mxu0 %vm3407_vm0, %v3406_v0  ;;  %v1809_v44 = vpack.c.bf16 %v3256_v41, %v3256_v41 }
 0x558   :  { %3093 = vmatprep.mubr.msk.bf16.mxu1 %vm3407_vm0, %v3406_v0 }
 0x559   :  { %3084 = vmatpush3.bf16.msra.mxu0 %v3543_v33  ;;  %v3838_v43 = vsel %vm2398_vm6, %v3787_v53, %v2492_v42  ;;  %v3286_v33 = vld [vmem:[#allocation5] sm:$0xff]  }
 0x55a   :  { %3092 = vmatpush3.bf16.msra.mxu1 %v3547_v34  ;;  %3097 = vmatprep.subr.bf16.mxu0 %v3406_v0 }
 0x55b   :  { %3105 = vmatprep.subr.bf16.mxu1 %v3406_v0 }
 0x55c   :  { %3086 = vmatmul.mubr.msk.bf16.vlgmr.msra.gmra.mxu0 %vm221_vm3, %v1809_v44 }
 0x55d   :  { %3094 = vmatmul.mubr.msk.bf16.vlgmr.msra.gmra.mxu1 %vm221_vm3, %v1674_v36  ;;  %3098 = vmatpush3.bf16.msra.mxu0 %v3285_v45 }
 0x55e   :  { %3106 = vmatpush3.bf16.msra.mxu1 %v3285_v45  ;;  %3099 = vmatprep.subr.bf16.mxu0 %v3406_v0 }
 0x55f   :  { %3107 = vmatprep.subr.bf16.mxu1 %v3406_v0  ;;  %3101 = vmatprep.mubr.msk.bf16.mxu0 %vm3407_vm0, %v3406_v0 }
 0x560   :  { %3109 = vmatprep.mubr.msk.bf16.mxu1 %vm3407_vm0, %v3406_v0 }
 0x561   :  { %3100 = vmatpush3.bf16.msra.mxu0 %v3286_v33 }
 0x562   :  { %3108 = vmatpush3.bf16.msra.mxu1 %v3286_v33  ;;  %3113 = vmatprep.subr.bf16.mxu0 %v3406_v0 }
 0x563   :  { %3121 = vmatprep.subr.bf16.mxu1 %v3406_v0 }
 0x60c   :  { %v1659_v46 = vpop.f32.mrf.mxu0 }
 0x60d   :  { %v1666_v47 = vrot.slane %v1659_v46, 2  ;;  %v1712_v49 = vpop.f32.mrf.mxu1 }
 0x60e   :  { %v1719_v50 = vrot.slane %v1712_v49, 2  ;;  %v3055_v51 = vpop.f32.mrf.mxu0 }
 0x60f   :  { %v1668_v52 = vadd.f32 %v1666_v47, %v3526_v20  ;;  %v3063_v53 = vpop.f32.mrf.mxu1 }
 0x610   :  { %v1721_v54 = vadd.f32 %v1719_v50, %v3524_v17  ;;  %v1662_v7 = vpop.f32.mrf.mxu0  ;;  %v3926_v53 = vld [vmem:[%s3994_s6] sm:$0x1] }
 0x611   :  { %3257 = vtanh.f32 %v1668_v52  ;;  %v1715_v55 = vpop.f32.mrf.mxu1 }
 0x612   :  { %3259 = vtanh.f32 %v1721_v54  ;;  %v3056_v56 = vpop.f32.mrf.mxu0 }
 0x613   :  { %v3064_v9 = vpop.f32.mrf.mxu1 }
 0x614   :  { %v1761_v57 = vpop.f32.mrf.mxu0 }
 0x615   :  { %v1801_v58 = vpop.f32.mrf.mxu1 }
 0x616   :  { %v1802_v59 = vadd.f32 %v1801_v58, %v1761_v57  ;;  %v3071_v60 = vpop.f32.mrf.mxu0 }
 0x617   :  { %v3079_v11 = vpop.f32.mrf.mxu1 }
 0x618   :  { %v1807_v61 = vadd.f32 %v1802_v59, %v3583_v48  ;;  %v1764_v8 = vpop.f32.mrf.mxu0 }
 0x619   :  { %v1804_v62 = vpop.f32.mrf.mxu1 }
 0x61a   :  { %3261 = vtanh.f32 %v1807_v61  ;;  %v3072_v63 = vpop.f32.mrf.mxu0 }
 0x61b   :  { %v3080_v1 = vpop.f32.mrf.mxu1 }
 0x61c   :  { %v1847_v2 = vpop.f32.mrf.mxu0 }
 0x61d   :  { %v1887_v3 = vpop.f32.mrf.mxu1 }
 0x61e   :  { %v3258_v4 = vpop.eup %3257  ;;  %v1888_v5 = vadd.f32 %v1887_v3, %v1847_v2  ;;  %v3087_v6 = vpop.f32.mrf.mxu0 }
 0x61f   :  { %v3260_v10 = vpop.eup %3259  ;;  %v1895_v12 = vpack.c.bf16 %v3258_v4, %v3258_v4  ;;  %v3095_v13 = vpop.f32.mrf.mxu1 }
 0x620   :  { %v1946_v14 = vpack.c.bf16 %v3260_v10, %v3260_v10  ;;  %v1893_v15 = vadd.f32 %v1888_v5, %v3583_v48  ;;  %v1850_v16 = vpop.f32.mrf.mxu0 }
 0x621   :  { %v1897_v18 = vrot.slane %v1895_v12, 3  ;;  %v1890_v19 = vpop.f32.mrf.mxu1 }
 0x622   :  { %v1948_v21 = vrot.slane %v1946_v14, 3  ;;  %3263 = vtanh.f32 %v1893_v15  ;;  %v3088_v22 = vpop.f32.mrf.mxu0 }
 0x623   :  { %v3096_v23 = vpop.f32.mrf.mxu1  ;;  %3102 = vmatmul.mubr.msk.bf16.vlgmr.msra.gmra.mxu0 %vm221_vm3, %v1897_v18 }
 0x624   :  { %3110 = vmatmul.mubr.msk.bf16.vlgmr.msra.gmra.mxu1 %vm221_vm3, %v1948_v21  ;;  %3114 = vmatpush3.bf16.msra.mxu0 %v3533_v28 }
 0x625   :  { %3122 = vmatpush3.bf16.msra.mxu1 %v3535_v31  ;;  %3115 = vmatprep.subr.bf16.mxu0 %v3406_v0 }
 0x626   :  { %3123 = vmatprep.subr.bf16.mxu1 %v3406_v0  ;;  %3117 = vmatprep.mubr.msk.bf16.mxu0 %vm3407_vm0, %v3406_v0 }
 0x627   :  { %v3262_v48 = vpop.eup %3261  ;;  %3125 = vmatprep.mubr.msk.bf16.mxu1 %vm3407_vm0, %v3406_v0 }
 0x628   :  { %v2386_v24 = vrot.slane %v3262_v48, 3  ;;  %3116 = vmatpush3.bf16.msra.mxu0 %v3870_v25  ;;  %v1997_v28 = vpack.c.bf16 %v3262_v48, %v3262_v48 }
 0x629   :  { %3124 = vmatpush3.bf16.msra.mxu1 %v3547_v34  ;;  %3129 = vmatprep.subr.bf16.mxu0 %v3406_v0  ;;  %v3888_v34 = vld [vmem:[#allocation8 + $0x8] sm:$0xff]  }
 0x62a   :  { %3137 = vmatprep.subr.bf16.mxu1 %v3406_v0  ;;  %v3878_v31 = vsel %vm2400_vm7, %v3820_v39, %v2386_v24  ;;  %v3211_v24 = vld [vmem:[%s3995_s7 + $0x8] sm:$0xff]  }
 0x62b   :  { %3118 = vmatmul.mubr.msk.bf16.vlgmr.msra.gmra.mxu0 %vm221_vm3, %v1997_v28 }
 0x62c   :  { %3126 = vmatmul.mubr.msk.bf16.vlgmr.msra.gmra.mxu1 %vm221_vm3, %v1897_v18  ;;  %3130 = vmatpush3.bf16.msra.mxu0 %v3885_v26 }
 0x62d   :  { %3138 = vmatpush3.bf16.msra.mxu1 %v3888_v34  ;;  %3131 = vmatprep.subr.bf16.mxu0 %v3406_v0 }
 0x62e   :  { %3139 = vmatprep.subr.bf16.mxu1 %v3406_v0  ;;  %3133 = vmatprep.mubr.msk.bf16.mxu0 %vm3407_vm0, %v3406_v0 }
 0x62f   :  { %v3264_v27 = vpop.eup %3263  ;;  %3141 = vmatprep.mubr.msk.bf16.mxu1 %vm3407_vm0, %v3406_v0 }
 0x630   :  { %v2495_v29 = vrot.slane %v3264_v27, 3  ;;  %3132 = vmatpush3.bf16.msra.mxu0 %v3870_v25  ;;  %v2083_v32 = vpack.c.bf16 %v3264_v27, %v3264_v27 }
 0x631   :  { %3140 = vmatpush3.bf16.msra.mxu1 %v3898_v30  ;;  %3145 = vmatprep.subr.bf16.mxu0 %v3406_v0 }
 0x632   :  { %3153 = vmatprep.subr.bf16.mxu1 %v3406_v0  ;;  %v3905_v35 = vsel %vm2400_vm7, %v3838_v43, %v2495_v29 }
 0x633   :  { %3134 = vmatmul.mubr.msk.bf16.vlgmr.msra.gmra.mxu0 %vm221_vm3, %v2083_v32 }
 0x634   :  { %3142 = vmatmul.mubr.msk.bf16.vlgmr.msra.gmra.mxu1 %vm221_vm3, %v1948_v21  ;;  %3146 = vmatpush3.bf16.msra.mxu0 %v3885_v26 }
 0x635   :  { %3154 = vmatpush3.bf16.msra.mxu1 %v3888_v34  ;;  %3157 = vmatprep.mubr.msk.bf16.mxu1 %vm3407_vm0, %v3406_v0 }
 0x636   :  { %3155 = vmatprep.subr.bf16.mxu1 %v3406_v0  ;;  %3147 = vmatprep.subr.bf16.mxu0 %v3406_v0 }
 0x637   :  { %3149 = vmatprep.mubr.msk.bf16.mxu0 %vm3407_vm0, %v3406_v0 }
 0x638   :  { %3148 = vmatpush3.bf16.msra.mxu0 %v3870_v25 }
 0x639   :  { %3156 = vmatpush3.bf16.msra.mxu1 %v3898_v30  ;;  %3161 = vmatprep.subr.bf16.mxu0 %v3406_v0 }
 0x63a   :  { %3169 = vmatprep.subr.bf16.mxu1 %v3406_v0 }
 0x6e3   :  { %v1935_v36 = vpop.f32.mrf.mxu0 }
 0x6e4   :  { %v1942_v37 = vrot.slane %v1935_v36, 1  ;;  %v1986_v38 = vpop.f32.mrf.mxu1 }
 0x6e5   :  { %v1993_v39 = vrot.slane %v1986_v38, 1  ;;  %v3103_v40 = vpop.f32.mrf.mxu0 }
 0x6e6   :  { %v1944_v41 = vadd.f32 %v1942_v37, %v3526_v20  ;;  %v3111_v42 = vpop.f32.mrf.mxu1 }
 0x6e7   :  { %v1995_v43 = vadd.f32 %v1993_v39, %v3524_v17  ;;  %v1938_v44 = vpop.f32.mrf.mxu0 }
 0x6e8   :  { %3265 = vtanh.f32 %v1944_v41  ;;  %v1989_v45 = vpop.f32.mrf.mxu1 }
 0x6e9   :  { %3267 = vtanh.f32 %v1995_v43  ;;  %v3104_v33 = vpop.f32.mrf.mxu0 }
 0x6ea   :  { %v3112_v46 = vpop.f32.mrf.mxu1 }
 0x6eb   :  { %v2035_v47 = vpop.f32.mrf.mxu0 }
 0x6ec   :  { %v2075_v49 = vpop.f32.mrf.mxu1 }
 0x6ed   :  { %v2076_v50 = vadd.f32 %v2075_v49, %v2035_v47  ;;  %v3119_v51 = vpop.f32.mrf.mxu0 }
 0x6ee   :  { %v3127_v52 = vpop.f32.mrf.mxu1 }
 0x6ef   :  { %v2081_v20 = vadd.f32 %v3926_v53, %v2076_v50  ;;  %v2038_v54 = vpop.f32.mrf.mxu0 }
 0x6f0   :  { %v2078_v17 = vpop.f32.mrf.mxu1 }
 0x6f1   :  { %3269 = vtanh.f32 %v2081_v20  ;;  %v3120_v7 = vpop.f32.mrf.mxu0 }
 0x6f2   :  { %v3128_v55 = vpop.f32.mrf.mxu1 }
 0x6f3   :  { %v2121_v56 = vpop.f32.mrf.mxu0 }
 0x6f4   :  { %v2161_v9 = vpop.f32.mrf.mxu1 }
 0x6f5   :  { %v3266_v57 = vpop.eup %3265  ;;  %v2162_v58 = vadd.f32 %v2161_v9, %v2121_v56  ;;  %v3135_v59 = vpop.f32.mrf.mxu0 }
 0x6f6   :  { %v3268_v60 = vpop.eup %3267  ;;  %v3143_v11 = vpop.f32.mrf.mxu1  ;;  %v2213_v61 = vpack.c.bf16 %v3266_v57, %v3266_v57  ;;  %v2358_v8 = vrot.slane %v3266_v57, 7 }
 0x6f7   :  { %v2167_v62 = vadd.f32 %v3926_v53, %v2162_v58  ;;  %v2124_v63 = vpop.f32.mrf.mxu0  ;;  %v2361_v1 = vrot.slane %v3268_v60, 6  ;;  %v2307_v12 = vpack.c.bf16 %v3268_v60, %v3268_v60 }
 0x6f8   :  { %v2164_v2 = vpop.f32.mrf.mxu1  ;;  %v2215_v3 = vshrl.u32 %v2213_v61, 16 }
 0x6f9   :  { %3271 = vtanh.f32 %v2167_v62  ;;  %v3136_v4 = vpop.f32.mrf.mxu0  ;;  %v2364_v5 = vsel %vm2363_vm4, %v2358_v8, %v2361_v1  ;;  %v2309_v14 = vshrl.u32 %v2307_v12, 16 }
 0x6fa   :  { %v3144_v6 = vpop.f32.mrf.mxu1  ;;  %v2217_v10 = vrot.slane %v2215_v3, 3  ;;  %2366 = vst.msk [vmem:[#allocation10] sm:$0x3] %vm2365_vm8, %v2364_v5 }
 0x6fb   :  { %v2311_v19 = vrot.slane %v2309_v14, 3 }
 0x6fc   :  { %3158 = vmatmul.mubr.msk.bf16.vlgmr.msra.gmra.mxu1 %vm221_vm3, %v2217_v10 }
 0x6fd   :  { %3170 = vmatpush3.bf16.msra.mxu1 %v3888_v34  ;;  %3173 = vmatprep.mubr.msk.bf16.mxu1 %vm3407_vm0, %v3406_v0 }
 0x6fe   :  { %v3270_v13 = vpop.eup %3269  ;;  %3171 = vmatprep.subr.bf16.mxu1 %v3406_v0 }
 0x6ff   :  { %v2389_v15 = vrot.slane %v3270_v13, 2  ;;  %v2169_v16 = vpack.c.bf16 %v3270_v13, %v3270_v13 }
 0x701   :  { %3150 = vmatmul.mubr.msk.bf16.vlgmr.msra.gmra.mxu0 %vm221_vm3, %v2169_v16  ;;  %3172 = vmatpush3.bf16.msra.mxu1 %v3898_v30  ;;  %v2403_v18 = vsel %vm2402_vm9, %v3878_v31, %v2389_v15 }
 0x702   :  { %3162 = vmatpush3.bf16.msra.mxu0 %v3885_v26  ;;  %3165 = vmatprep.mubr.msk.bf16.mxu0 %vm3407_vm0, %v3406_v0 }
 0x703   :  { %3163 = vmatprep.subr.bf16.mxu0 %v3406_v0  ;;  %3185 = vmatprep.subr.bf16.mxu1 %v3406_v0 }
 0x704   :  { %3174 = vmatmul.mubr.msk.bf16.vlgmr.msra.gmra.mxu1 %vm221_vm3, %v2311_v19 }
 0x705   :  { %3189 = vmatprep.mubr.msk.bf16.mxu1 %vm3407_vm0, %v3406_v0  ;;  %3186 = vmatpush3.bf16.msra.mxu1 %v3211_v24 }
 0x706   :  { %v3272_v21 = vpop.eup %3271  ;;  %3164 = vmatpush3.bf16.msra.mxu0 %v3870_v25  ;;  %v3212_v25 = vld [vmem:[%s3995_s7] sm:$0xff]   ;;  %3187 = vmatprep.subr.bf16.mxu1 %v3406_v0 }
 0x707   :  { %v2498_v22 = vrot.slane %v3272_v21, 2  ;;  %v2263_v23 = vpack.c.bf16 %v3272_v21, %v3272_v21  ;;  %3177 = vmatprep.subr.bf16.mxu0 %v3406_v0 }
 0x709   :  { %3166 = vmatmul.mubr.msk.bf16.vlgmr.msra.gmra.mxu0 %vm221_vm3, %v2263_v23  ;;  %v2507_v48 = vsel %vm2402_vm9, %v3905_v35, %v2498_v22  ;;  %3188 = vmatpush3.bf16.msra.mxu1 %v3212_v25 }
 0x70a   :  { %3181 = vmatprep.mubr.msk.bf16.mxu0 %vm3407_vm0, %v3406_v0  ;;  %3178 = vmatpush3.bf16.msra.mxu0 %v3211_v24 }
 0x70b   :  { %3179 = vmatprep.subr.bf16.mxu0 %v3406_v0 }
 0x70e   :  { %3180 = vmatpush3.bf16.msra.mxu0 %v3212_v25 }
 0x7bc   :  { %v2255_v28 = vpop.f32.mrf.mxu1 }
 0x7be   :  { %v3159_v31 = vpop.f32.mrf.mxu1 }
 0x7c0   :  { %v2258_v26 = vpop.f32.mrf.mxu1 }
 0x7c1   :  { %v2207_v34 = vpop.f32.mrf.mxu0 }
 0x7c2   :  { %v2256_v27 = vadd.f32 %v2255_v28, %v2207_v34  ;;  %v3160_v29 = vpop.f32.mrf.mxu1 }
 0x7c3   :  { %v3151_v30 = vpop.f32.mrf.mxu0 }
 0x7c4   :  { %v2261_v32 = vadd.f32 %v3926_v53, %v2256_v27  ;;  %v2349_v35 = vpop.f32.mrf.mxu1 }
 0x7c5   :  { %v2210_v36 = vpop.f32.mrf.mxu0 }
 0x7c6   :  { %3273 = vtanh.f32 %v2261_v32  ;;  %v3175_v37 = vpop.f32.mrf.mxu1 }
 0x7c7   :  { %v3152_v38 = vpop.f32.mrf.mxu0 }
 0x7c8   :  { %v2352_v39 = vpop.f32.mrf.mxu1 }
 0x7c9   :  { %v2301_v40 = vpop.f32.mrf.mxu0 }
 0x7ca   :  { %v2350_v41 = vadd.f32 %v2349_v35, %v2301_v40  ;;  %v3176_v0 = vpop.f32.mrf.mxu1 }
 0x7cb   :  { %v3167_v42 = vpop.f32.mrf.mxu0 }
 0x7cc   :  { %v2355_v43 = vadd.f32 %v3926_v53, %v2350_v41  ;;  %v2644_v53 = vld [vmem:[%s3996_s8] ss:$0 sm:$0xff]  ;;  %s3409_s8 = smov [#allocation10]  }
 0x7cd   :  { %v2304_v44 = vpop.f32.mrf.mxu0  ;;  %s2574_s29 = sshll.u32 %s3409_s8, 4  ;;  %s2575_s29 = int_to_ptr.vmem [resolvable:$true] %s2574_s29 }
 0x7ce   :  { %3275 = vtanh.f32 %v2355_v43  ;;  %s3372_s30 = scalar_lea.vmem %s2575_s29, 64  ;;  %p3377_p7 = scmp.lt.s32.totalorder %s2575_s29, %s2575_s29 }
 0x7cf   :  { %v3168_v45 = vpop.f32.mrf.mxu0  ;;  %p3373_p6 = scmp.ne.s32.totalorder %s2575_s29, %s3372_s30  ;;  %p3378_p8 = scmp.lt.s32.totalorder %s3372_s30, %s3372_s30 }
 0x7d1   :  { %p3379_p9 = por %p3378_p8, %p3377_p7 }
 0x7d3   :  { %v3274_v33 = vpop.eup %3273  ;;  %p3380_p10 = pnand %p3379_p9, %p3373_p6 }
 0x7d4   :  { %v2392_v46 = vrot.slane %v3274_v33, 1 }
 0x7d6   :  { %v2405_v47 = vsel %vm2404_vm10, %v2403_v18, %v2392_v46 }
 0x7d7   :  { %v2406_v49 = vpack.c.bf16 %v2405_v47, %v2405_v47 }
 0x7d9   :  { %3182 = vmatmul.mubr.msk.bf16.vlgmr.msra.gmra.mxu0 %vm221_vm3, %v2406_v49 }
 0x7db   :  { %v3276_v50 = vpop.eup %3275 }
 0x7dc   :  { %v2500_v51 = vrot.slane %v3276_v50, 1  ;;  %v2368_v52 = vrot.slane %v3276_v50, 7 }
 0x7de   :  { %v2508_v20 = vsel %vm2404_vm10, %v2507_v48, %v2500_v51  ;;  %v2370_v54 = vsel %vm2363_vm4, %v3274_v33, %v2368_v52 }
 0x7df   :  { %v2509_v17 = vpack.c.bf16 %v2508_v20, %v2508_v20  ;;  %2372 = vst.msk [vmem:[#allocation10 + $0x2] sm:$0x3] %vm2365_vm8, %v2370_v54 }
 0x7e1   :  { %3190 = vmatmul.mubr.msk.bf16.vlgmr.msra.gmra.mxu1 %vm221_vm3, %v2509_v17 }
 0x899   :  { %v2462_v7 = vpop.f32.mrf.mxu0 }
 0x89a   :  { %v2463_v55 = vadd.f32 %v2644_v53, %v2462_v7 }
 0x89b   :  { %v3183_v56 = vpop.f32.mrf.mxu0 }
 0x89c   :  { %v2468_v9 = vsel %vm115_vm2, %v2463_v55, -inf }
 0x89d   :  { %2469 = vmax.xlane.f32.xlu0 %v2468_v9  ;;  %v2465_v57 = vpop.f32.mrf.mxu0 }
 0x89f   :  { %v3184_v58 = vpop.f32.mrf.mxu0 }
 0x8a1   :  { %v2547_v59 = vpop.f32.mrf.mxu1 }
 0x8a2   :  { %v2548_v60 = vadd.f32 %v2644_v53, %v2547_v59 }
 0x8a3   :  { %v3191_v11 = vpop.f32.mrf.mxu1 }
 0x8a4   :  { %v2553_v61 = vsel %vm115_vm2, %v2548_v60, -inf }
 0x8a5   :  { %v2550_v8 = vpop.f32.mrf.mxu1  ;;  %2554 = vmax.xlane.f32.xlu0 %v2553_v61 }
 0x8a7   :  { %v3192_v62 = vpop.f32.mrf.mxu1 }
 0x926   :  { %v2470_v63 = vpop.xlane.xlu0 %2469 }
 0x927   :  { %v2471_v1 = vsub.f32 %v2463_v55, %v2470_v63 }
 0x929   :  { %v2472_v2 = vmul.f32 1.442695, %v2471_v1 }
 0x92b   :  { %3277 = vpow2.f32 %v2472_v2 }
 0x92e   :  { %v2555_v3 = vpop.xlane.xlu0 %2554 }
 0x92f   :  { %v2556_v4 = vsub.f32 %v2548_v60, %v2555_v3 }
 0x931   :  { %v2557_v5 = vmul.f32 1.442695, %v2556_v4 }
 0x933   :  { %3279 = vpow2.f32 %v2557_v5 }
 0x938   :  { %v3278_v6 = vpop.eup %3277 }
 0x939   :  { %v2474_v10 = vsel %vm115_vm2, %v3278_v6, 0.0 }
 0x93a   :  { %2475 = vadd.xlane.f32.xlu1 %v2474_v10 }
 0x940   :  { %v3280_v12 = vpop.eup %3279 }
 0x941   :  { %v2559_v13 = vsel %vm115_vm2, %v3280_v12, 0.0 }
 0x942   :  { %2560 = vadd.xlane.f32.xlu1 %v2559_v13 }
 0x943   :  { %3383 = shalt.err (!%p3380_p10)
}
 0x944   :  { %s3410_s11 = smov 32   ;;  %s3411_s12 = smov 2  }
 0x945   :  { %2580 = dma.vmem_to_hbm [thread:$0]  %s2575_s29, 64, %s3998_s10, [#allocation4], %s3410_s11, %s3410_s11, %s3411_s12  }
 0x9c3   :  { %v2476_v14 = vpop.xlane.xlu1 %2475 }
 0x9c4   :  { %3281 = vlog2.f32 %v2476_v14 }
 0x9cb   :  { %v2561_v15 = vpop.xlane.xlu1 %2560 }
 0x9cc   :  { %3283 = vlog2.f32 %v2561_v15 }
 0x9d1   :  { %v3282_v16 = vpop.eup %3281 }
 0x9d2   :  { %v2478_v18 = vmul.f32 0.6931472, %v3282_v16 }
 0x9d4   :  { %v2479_v19 = vadd.f32 %v2478_v18, %v2470_v63 }
 0x9d6   :  { %v2480_v21 = vsub.f32 %v2463_v55, %v2479_v19 }
 0x9d8   :  { %2481 = vst.msk [vmem:[%s3997_s9] sm:$0xff] %vm115_vm2, %v2480_v21 }
 0x9d9   :  { %v3284_v22 = vpop.eup %3283 }
 0x9da   :  { %v2563_v23 = vmul.f32 0.6931472, %v3284_v22 }
 0x9dc   :  { %v2564_v48 = vadd.f32 %v2563_v23, %v2555_v3 }
 0x9de   :  { %v2565_v24 = vsub.f32 %v2548_v60, %v2564_v48 }
 0x9e0   :  { %2566 = vst.msk [vmem:[%s3997_s9 + $0x8] sm:$0xff] %vm115_vm2, %v2565_v24 }
 0x9e1   :  { %3398 = dma.done.wait [#allocation4], 64  }
 0x9e2   :  { %3399 = vsyncadd [#allocation4], 4294967232 }
 0x9e3   :  { %2586 = vsyncpa [#allocation3], 1 }
 0x9e4   :  { %2587 = vsyncpa [#allocation6], 1 }
 0x9e5   :  { %2588 = vsyncpa [#allocation9], 1 }
 0x9e6   :  { %2589 = vsyncpa [#allocation4], 1 }

</bundles_post_ra>
